<compile_context>
chip_gen: v7x
topology: tpu7x:2x2x1
jax: 0.10.0
libtpu: 0.0.40
codegen_flags: <defaults>
</compile_context>

<pallas_src>
import functools

import jax
import jax.numpy as jnp
from jax.experimental import pallas as pl
from jax.experimental.pallas import tpu as pltpu

# ---- packed parameter layout ------------------------------------------------
_LANES = 128          # lane width of every weight / bias / activation
_HROWS = 128          # padded K rows of fused layers 2 and 3 (2H = 32 <= 128)
_S_PAD = 8            # rows reserved for fused W1 in the small f32 buffer
_PF_ROWS = 16         # f32 buffer: rows [0,8) = W1, rows 8/9/10 = b1/b2/b3


def _net_kernel(x_ref, wb_ref, pf_ref, out_ref, *, n_states, n_actions):
    x = x_ref[...]                                    # (Bt, n_states) f32

    w1 = pf_ref[0:_S_PAD, :]                          # (8, 128)  f32 fused W1
    b1 = pf_ref[_S_PAD + 0:_S_PAD + 1, :]             # (1, 128)  f32
    b2 = pf_ref[_S_PAD + 1:_S_PAD + 2, :]
    b3 = pf_ref[_S_PAD + 2:_S_PAD + 3, :]
    w2 = wb_ref[0:_HROWS, :]                          # (128, 128) bf16 fused W2
    w3 = wb_ref[_HROWS:2 * _HROWS, :]                 # (128, 128) bf16 fused W3

    # ---- Layer 1 on the VPU (K is tiny; MXU would be badly underutilized) ---
    # lanes [0:H) = action head, [H:2H) = value head, remaining lanes stay 0.
    h1 = b1
    for k in range(n_states):                         # static unroll
        h1 = h1 + x[:, k:k + 1] * w1[k:k + 1, :]
    h1 = jnp.maximum(h1, 0.0)                         # (Bt, 128) f32

    # ---- Layers 2/3 on the MXU: bf16 operands, f32 accumulation -------------
    h2 = jnp.dot(h1.astype(jnp.bfloat16), w2,
                 preferred_element_type=jnp.float32) + b2
    h2 = jnp.maximum(h2, 0.0)
    y3 = jnp.dot(h2.astype(jnp.bfloat16), w3,
                 preferred_element_type=jnp.float32) + b3
    # y3 lanes: [0:n_actions) action logits, [n_actions] value, rest exactly 0.

    lane = jax.lax.broadcasted_iota(jnp.int32, y3.shape, 1)
    act_mask = lane < n_actions

    # masked softmax over the action lanes only
    logits = jnp.where(act_mask, y3, -jnp.inf)
    m = jnp.max(logits, axis=-1, keepdims=True)
    e = jnp.exp(logits - m)                           # masked lanes -> 0
    denom = jnp.sum(e, axis=-1, keepdims=True)
    probs = e / denom                                 # exact normalization

    # one lane-dense unmasked store: probs in [0:n_actions), value at lane
    # n_actions, zeros elsewhere (probs are already 0 on masked lanes).
    out_ref[...] = jnp.where(lane == n_actions, y3, probs)


def pack_params(params, n_states, n_actions):
    """Pack the 12 per-head tensors into (bf16 W2/W3 buffer, f32 W1+bias buffer)."""
    H = params["aw1"].shape[1]
    H2 = 2 * H
    assert n_actions + 1 <= _LANES and H2 <= _HROWS and n_states <= _S_PAD

    # fused layer-2 / layer-3 weights, block-diagonal over the two heads.
    w2 = jnp.zeros((_HROWS, _LANES), jnp.float32)
    w2 = w2.at[0:H, 0:H].set(params["aw2"]).at[H:H2, H:H2].set(params["vw2"])
    w3 = jnp.zeros((_HROWS, _LANES), jnp.float32)
    w3 = w3.at[0:H, 0:n_actions].set(params["aw3"])
    w3 = w3.at[H:H2, n_actions:n_actions + 1].set(params["vw3"])
    wbuf = jnp.concatenate([w2, w3], axis=0).astype(jnp.bfloat16)   # (256, 128)

    # small f32 buffer: fused W1 rows + the three fused bias rows.
    pf = jnp.zeros((_PF_ROWS, _LANES), jnp.float32)
    pf = pf.at[:n_states, 0:H].set(params["aw1"])
    pf = pf.at[:n_states, H:H2].set(params["vw1"])
    pf = pf.at[_S_PAD + 0, 0:H].set(params["ab1"]).at[_S_PAD + 0, H:H2].set(params["vb1"])
    pf = pf.at[_S_PAD + 1, 0:H].set(params["ab2"]).at[_S_PAD + 1, H:H2].set(params["vb2"])
    pf = pf.at[_S_PAD + 2, 0:n_actions].set(params["ab3"])
    pf = pf.at[_S_PAD + 2, n_actions:n_actions + 1].set(params["vb3"])
    return wbuf, pf


def net_forward(x, packed, n_actions, *, b_tile=256):
    """Returns (action_probs (B, n_actions), value (B, 1))."""
    wbuf, pf = packed
    B, S = x.shape
    x = x.astype(jnp.float32)

    # Avoid a wrapper-side HBM copy whenever the batch already tiles evenly.
    pad_b = (-B) % b_tile
    if pad_b:
        x = jnp.pad(x, ((0, pad_b), (0, 0)))
    Bp = B + pad_b

    out = pl.pallas_call(
        functools.partial(_net_kernel, n_states=S, n_actions=n_actions),
        out_shape=jax.ShapeDtypeStruct((Bp, _LANES), jnp.float32),
        grid=(Bp // b_tile,),
        in_specs=[
            pl.BlockSpec((b_tile, S), lambda i: (i, 0)),            # batch-tiled x
            pl.BlockSpec((2 * _HROWS, _LANES), lambda i: (0, 0)),   # resident bf16 W2/W3
            pl.BlockSpec((_PF_ROWS, _LANES), lambda i: (0, 0)),     # resident f32 W1+biases
        ],
        out_specs=pl.BlockSpec((b_tile, _LANES), lambda i: (i, 0)),
        compiler_params=pltpu.CompilerParams(dimension_semantics=("parallel",)),
    )(x, wbuf, pf)

    action = out[:B, :n_actions]
    value = out[:B, n_actions:n_actions + 1]
    return action, value


def init_params(key, n_states, n_actions, hidden=16):
    """PyTorch-style uniform(+/- 1/sqrt(fan_in)) init, per-head (unfused) layout."""
    def linear(key, fan_in, fan_out):
        kw, kb = jax.random.split(key)
        bound = 1.0 / jnp.sqrt(jnp.float32(fan_in))
        w = jax.random.uniform(kw, (fan_in, fan_out), jnp.float32, -bound, bound)
        b = jax.random.uniform(kb, (fan_out,), jnp.float32, -bound, bound)
        return w, b

    keys = jax.random.split(key, 6)
    aw1, ab1 = linear(keys[0], n_states, hidden)
    aw2, ab2 = linear(keys[1], hidden, hidden)
    aw3, ab3 = linear(keys[2], hidden, n_actions)
    vw1, vb1 = linear(keys[3], n_states, hidden)
    vw2, vb2 = linear(keys[4], hidden, hidden)
    vw3, vb3 = linear(keys[5], hidden, 1)
    return dict(
        aw1=aw1, ab1=ab1, aw2=aw2, ab2=ab2, aw3=aw3, ab3=ab3,
        vw1=vw1, vb1=vb1, vw2=vw2, vb2=vb2, vw3=vw3, vb3=vb3,
    )


def ref_forward(x, p):
    h = jnp.maximum(x @ p["aw1"] + p["ab1"], 0.0)
    h = jnp.maximum(h @ p["aw2"] + p["ab2"], 0.0)
    logits = h @ p["aw3"] + p["ab3"]
    act = jax.nn.softmax(logits, axis=-1)
    g = jnp.maximum(x @ p["vw1"] + p["vb1"], 0.0)
    g = jnp.maximum(g @ p["vw2"] + p["vb2"], 0.0)
    val = g @ p["vw3"] + p["vb3"]
    return act, val


if __name__ == "__main__":
    # CartPole-style sizes; batch 512 with b_tile=256 -> grid of 2 "parallel"
    # steps (amortizes per-step overhead, shards across both TCs on v7x).
    n_states, n_actions, batch = 4, 2, 512
    key = jax.random.PRNGKey(0)
    k_params, k_x = jax.random.split(key)

    params = init_params(k_params, n_states, n_actions)
    packed = pack_params(params, n_states, n_actions)
    x = jax.random.normal(k_x, (batch, n_states), jnp.float32)

    action, value = net_forward(x, packed, n_actions, b_tile=256)
    jax.block_until_ready((action, value))

    ract, rval = ref_forward(x, params)
    assert action.shape == (batch, n_actions) and value.shape == (batch, 1)
    # bf16 MXU operands for layers 2/3 -> relaxed (~1e-2) tolerance vs f32 ref.
    assert jnp.allclose(action, ract, atol=3e-2), (
        f"action mismatch, max err {float(jnp.max(jnp.abs(action - ract)))}")
    assert jnp.allclose(value, rval, atol=3e-2), (
        f"value mismatch, max err {float(jnp.max(jnp.abs(value - rval)))}")

    print("KERNEL_OK")
</pallas_src>

<mosaic_0001>
module attributes {stable_mosaic.version = 11 : i64} {
  func.func @_net_kernel(%arg0: i32, %arg1: memref<256x4xf32, #tpu.memory_space<vmem>>, %arg2: memref<256x128xbf16, #tpu.memory_space<vmem>>, %arg3: memref<16x128xf32, #tpu.memory_space<vmem>>, %arg4: memref<256x128xf32, #tpu.memory_space<vmem>>) attributes {dimension_semantics = [#tpu.dimension_semantics<parallel>], iteration_bounds = array<i64: 2>, scalar_prefetch = 0 : i64, scratch_operands = 0 : i64, tpu.core_type = #tpu.core_type<tc>, window_params = [{transform_indices = @transform_0, window_bounds = array<i64: 256, 4>}, {pipeline_mode = #tpu.pipeline_mode<synchronous>, transform_indices = @transform_1, window_bounds = array<i64: 256, 128>}, {pipeline_mode = #tpu.pipeline_mode<synchronous>, transform_indices = @transform_2, window_bounds = array<i64: 16, 128>}, {transform_indices = @transform_3, window_bounds = array<i64: 256, 128>}]} {
    %c0 = arith.constant 0 : index
    %c0_0 = arith.constant 0 : index
    %0 = vector.load %arg1[%c0, %c0_0] : memref<256x4xf32, #tpu.memory_space<vmem>>, vector<256x4xf32>
    %c0_1 = arith.constant 0 : index
    %c0_2 = arith.constant 0 : index
    %1 = vector.load %arg3[%c0_1, %c0_2] : memref<16x128xf32, #tpu.memory_space<vmem>>, vector<8x128xf32>
    %c8 = arith.constant 8 : index
    %c0_3 = arith.constant 0 : index
    %2 = vector.load %arg3[%c8, %c0_3] : memref<16x128xf32, #tpu.memory_space<vmem>>, vector<1x128xf32>
    %c9 = arith.constant 9 : index
    %c0_4 = arith.constant 0 : index
    %3 = vector.load %arg3[%c9, %c0_4] : memref<16x128xf32, #tpu.memory_space<vmem>>, vector<1x128xf32>
    %c10 = arith.constant 10 : index
    %c0_5 = arith.constant 0 : index
    %4 = vector.load %arg3[%c10, %c0_5] : memref<16x128xf32, #tpu.memory_space<vmem>>, vector<1x128xf32>
    %c0_6 = arith.constant 0 : index
    %c0_7 = arith.constant 0 : index
    %5 = vector.load %arg2[%c0_6, %c0_7] : memref<256x128xbf16, #tpu.memory_space<vmem>>, vector<128x128xbf16>
    %c128 = arith.constant 128 : index
    %c0_8 = arith.constant 0 : index
    %6 = vector.load %arg2[%c128, %c0_8] : memref<256x128xbf16, #tpu.memory_space<vmem>>, vector<128x128xbf16>
    %7 = vector.extract_strided_slice %0 {offsets = [0, 0], sizes = [256, 1], strides = [1, 1]} : vector<256x4xf32> to vector<256x1xf32>
    %8 = vector.extract_strided_slice %1 {offsets = [0, 0], sizes = [1, 128], strides = [1, 1]} : vector<8x128xf32> to vector<1x128xf32>
    %9 = vector.broadcast %7 : vector<256x1xf32> to vector<256x128xf32>
    %10 = vector.broadcast %8 : vector<1x128xf32> to vector<256x128xf32>
    %11 = arith.mulf %9, %10 : vector<256x128xf32>
    %12 = vector.broadcast %2 : vector<1x128xf32> to vector<256x128xf32>
    %13 = arith.addf %12, %11 : vector<256x128xf32>
    %14 = vector.extract_strided_slice %0 {offsets = [0, 1], sizes = [256, 1], strides = [1, 1]} : vector<256x4xf32> to vector<256x1xf32>
    %15 = vector.extract_strided_slice %1 {offsets = [1, 0], sizes = [1, 128], strides = [1, 1]} : vector<8x128xf32> to vector<1x128xf32>
    %16 = vector.broadcast %14 : vector<256x1xf32> to vector<256x128xf32>
    %17 = vector.broadcast %15 : vector<1x128xf32> to vector<256x128xf32>
    %18 = arith.mulf %16, %17 : vector<256x128xf32>
    %19 = arith.addf %13, %18 : vector<256x128xf32>
    %20 = vector.extract_strided_slice %0 {offsets = [0, 2], sizes = [256, 1], strides = [1, 1]} : vector<256x4xf32> to vector<256x1xf32>
    %21 = vector.extract_strided_slice %1 {offsets = [2, 0], sizes = [1, 128], strides = [1, 1]} : vector<8x128xf32> to vector<1x128xf32>
    %22 = vector.broadcast %20 : vector<256x1xf32> to vector<256x128xf32>
    %23 = vector.broadcast %21 : vector<1x128xf32> to vector<256x128xf32>
    %24 = arith.mulf %22, %23 : vector<256x128xf32>
    %25 = arith.addf %19, %24 : vector<256x128xf32>
    %26 = vector.extract_strided_slice %0 {offsets = [0, 3], sizes = [256, 1], strides = [1, 1]} : vector<256x4xf32> to vector<256x1xf32>
    %27 = vector.extract_strided_slice %1 {offsets = [3, 0], sizes = [1, 128], strides = [1, 1]} : vector<8x128xf32> to vector<1x128xf32>
    %28 = vector.broadcast %26 : vector<256x1xf32> to vector<256x128xf32>
    %29 = vector.broadcast %27 : vector<1x128xf32> to vector<256x128xf32>
    %30 = arith.mulf %28, %29 : vector<256x128xf32>
    %31 = arith.addf %25, %30 : vector<256x128xf32>
    %cst = arith.constant 0.000000e+00 : f32
    %32 = vector.broadcast %cst : f32 to vector<256x128xf32>
    %33 = arith.maximumf %31, %32 : vector<256x128xf32>
    %34 = arith.truncf %33 : vector<256x128xf32> to vector<256x128xbf16>
    %cst_9 = arith.constant dense<0.000000e+00> : vector<256x128xf32>
    %35 = tpu.matmul %34, %5, %cst_9 {dimension_numbers = #tpu.dot_dimension_numbers<[1], [0], [0], [1], [0, 0, 1, 1], [], []>} : vector<256x128xbf16>, vector<128x128xbf16>, vector<256x128xf32> -> vector<256x128xf32>
    %36 = vector.broadcast %3 : vector<1x128xf32> to vector<256x128xf32>
    %37 = arith.addf %35, %36 : vector<256x128xf32>
    %cst_10 = arith.constant 0.000000e+00 : f32
    %38 = vector.broadcast %cst_10 : f32 to vector<256x128xf32>
    %39 = arith.maximumf %37, %38 : vector<256x128xf32>
    %40 = arith.truncf %39 : vector<256x128xf32> to vector<256x128xbf16>
    %cst_11 = arith.constant dense<0.000000e+00> : vector<256x128xf32>
    %41 = tpu.matmul %40, %6, %cst_11 {dimension_numbers = #tpu.dot_dimension_numbers<[1], [0], [0], [1], [0, 0, 1, 1], [], []>} : vector<256x128xbf16>, vector<128x128xbf16>, vector<256x128xf32> -> vector<256x128xf32>
    %42 = vector.broadcast %4 : vector<1x128xf32> to vector<256x128xf32>
    %43 = arith.addf %41, %42 : vector<256x128xf32>
    %44 = tpu.iota {dimensions = array<i32: 1>} : vector<256x128xi32>
    %c2_i32 = arith.constant 2 : i32
    %45 = vector.broadcast %c2_i32 : i32 to vector<256x128xi32>
    %46 = arith.cmpi slt, %44, %45 : vector<256x128xi32>
    %cst_12 = arith.constant 0xFF800000 : f32
    %47 = vector.broadcast %cst_12 : f32 to vector<256x128xf32>
    %48 = arith.select %46, %43, %47 : vector<256x128xi1>, vector<256x128xf32>
    %cst_13 = arith.constant dense<0xFF800000> : vector<256xf32>
    %49 = vector.multi_reduction <maximumf>, %48, %cst_13 [1] : vector<256x128xf32> to vector<256xf32>
    %50 = vector.shape_cast %49 : vector<256xf32> to vector<256x1xf32>
    %51 = vector.broadcast %50 : vector<256x1xf32> to vector<256x128xf32>
    %52 = arith.subf %48, %51 : vector<256x128xf32>
    %53 = math.exp %52 : vector<256x128xf32>
    %cst_14 = arith.constant dense<0.000000e+00> : vector<256xf32>
    %54 = vector.multi_reduction <add>, %53, %cst_14 [1] : vector<256x128xf32> to vector<256xf32>
    %55 = vector.shape_cast %54 : vector<256xf32> to vector<256x1xf32>
    %56 = vector.broadcast %55 : vector<256x1xf32> to vector<256x128xf32>
    %57 = arith.divf %53, %56 : vector<256x128xf32>
    %c2_i32_15 = arith.constant 2 : i32
    %58 = vector.broadcast %c2_i32_15 : i32 to vector<256x128xi32>
    %59 = arith.cmpi eq, %44, %58 : vector<256x128xi32>
    %60 = arith.select %59, %43, %57 : vector<256x128xi1>, vector<256x128xf32>
    %c0_16 = arith.constant 0 : index
    %c0_17 = arith.constant 0 : index
    %61 = vector.load %arg4[%c0_16, %c0_17] : memref<256x128xf32, #tpu.memory_space<vmem>>, vector<256x128xf32>
    tpu.vector_store %arg4[%c0_16, %c0_17], %60 {strides = array<i32>} : memref<256x128xf32, #tpu.memory_space<vmem>>, vector<256x128xf32>,
    return
  }
  func.func @transform_0(%arg0: i32) -> (i32, i32) {
    %c0_i32 = arith.constant 0 : i32
    %c0_i32_0 = arith.constant 0 : i32
    return %arg0, %c0_i32 : i32, i32
  }
  func.func @transform_1(%arg0: i32) -> (i32, i32) {
    %c0_i32 = arith.constant 0 : i32
    %c0_i32_0 = arith.constant 0 : i32
    %c0_i32_1 = arith.constant 0 : i32
    return %c0_i32, %c0_i32_0 : i32, i32
  }
  func.func @transform_2(%arg0: i32) -> (i32, i32) {
    %c0_i32 = arith.constant 0 : i32
    %c0_i32_0 = arith.constant 0 : i32
    %c0_i32_1 = arith.constant 0 : i32
    return %c0_i32, %c0_i32_0 : i32, i32
  }
  func.func @transform_3(%arg0: i32) -> (i32, i32) {
    %c0_i32 = arith.constant 0 : i32
    %c0_i32_0 = arith.constant 0 : i32
    return %arg0, %c0_i32 : i32, i32
  }
}

</mosaic_0001>

<bundles_post_ra>
// kernel: tpu_custom_call.1
= control target key start
LH: loop header
LB: loop body
LE: loop exit
PB: predicated region body
PF: predicated region fallthrough
CT: control target
= control target key end

     0   :  { %8 = vsyncpa [#allocation3], 0  ;;  %s3929_s0 = inlined_call_operand.vmem [shape: f32[512,4], index: 0, kind: input, shape index: {}]   ;;  %s3930_s1 = inlined_call_operand.vmem [shape: bf16[256,128], index: 1, kind: input, shape index: {}]   ;;  %s3931_s2 = inlined_call_operand.vmem [shape: f32[16,128], index: 2, kind: input, shape index: {}]   ;;  %s3932_s3 = inlined_call_operand.hbm [shape: f32[512,128], index: 3, kind: output, shape index: {}]  }
   0x1   :  { %10 = vsyncpa [#allocation3 + $0x1], 0  ;;  %s2539_s12 = smov 0   ;;  %s2541_s13 = smov 0  }
   0x2   :  { %s2543_s14 = smov 0   ;;  %s2545_s15 = smov 0  }
   0x3 LB: > { %s2560_s16 = sadd.s32 4294967295, %s2510_s15   ;;  %s2047_s17 = sadd.s32 4294967294, %s2510_s15   ;;  %s2510_s15 = sphi %s2545_s15, %s4044_s15   ;;  %s2506_s14 = sphi %s2543_s14, %s4043_s14   ;;  %s2502_s13 = sphi %s2541_s13, %s4042_s13   ;;  %s2498_s12 = sphi %s2539_s12, %s4041_s12  }
   0x4   : > { %s2564_s18 = sadd.s32 1, %s2510_s15   ;;  %s91_s19 = sadd.s32 1, %s2506_s14 }
   0x5   : > { %s88_s20 = ssub.s32 %s2510_s15, %s2564_s18  ;;  %p101_p0 = scmp.ne.s32.totalorder %s2506_s14, %s2502_s13 }
   0x6   : > { %p89_p1 = scmp.eq.s32.totalorder %s88_s20, 0  ;;  %p102_p2 = scmp.eq.s32.totalorder %s2560_s16, 1 }
   0x7   : > { %p107_p3 = scmp.ne.s32.totalorder %s2502_s13, %s2498_s12  ;;  %p108_p4 = scmp.eq.s32.totalorder %s2047_s17, 1 }
   0x8   : > { %s2575_s21 = scalar_select %p89_p1, %s2506_s14, %s91_s19  }
   0x9   : > { %p2577_p5 = por %p102_p2, %p101_p0  ;;  %p2581_p6 = por %p108_p4, %p107_p3 }
   0xa   : > { %p2050_p7 = scmp.ge.s32.totalorder %s2510_s15, 1  ;;  %p141_p8 = scmp.lt.s32.totalorder %s2510_s15, 3 }
   0xc   : > { %p142_p9 = pnand %p2050_p7, %p141_p8 }
   0xe   : > { %145 = sbr.rel (%p142_p9) target bundleno = 1279 (0x4ff), region = 32 }
  0x15   : > { %s2052_s24 = sshll.u32 %s2560_s16, 5  ;;  %v3933_v0 = vmov 0   ;;  %v3939_v6 = vmov 1   ;;  %v3937_v9 = vmov 2   ;;  %v3935_v14 = vmov 3   ;;  %v2304_v31 = vld [vmem:[%s3930_s1] sm:$0xff]  }
  0x16   : > { %2269 = vset.pattern.permute.xlu1 %v3933_v0  ;;  %2268 = vset.pattern.permute.xlu0 %v3933_v0  ;;  %p166_p10 = scmp.lt.s32.totalorder %s2052_s24, 63  ;;  %v2305_v32 = vld [vmem:[%s3930_s1 + $0x8] sm:$0xff]   ;;  %v2306_v33 = vld [vmem:[%s3930_s1 + $0x10] sm:$0xff]   ;;  %v2307_v34 = vld [vmem:[%s3930_s1 + $0x18] sm:$0xff]   ;;  %s162_s6 = sand.u32 1, %s2502_s13  }
  0x17   : > { %2127 = vmatprep.subr.bf16.mxu0 %v2304_v31  ;;  %v2308_v38 = vld [vmem:[%s3930_s1 + $0x20] sm:$0xff]   ;;  %v2309_v41 = vld [vmem:[%s3930_s1 + $0x28] sm:$0xff]   ;;  %v2310_v44 = vld [vmem:[%s3930_s1 + $0x30] sm:$0xff]   ;;  %s2051_s7 = sshll.u32 %s162_s6, 8  ;;  %s2078_s9 = sshll.u32 %s2560_s16, 12 }
  0x18   : > { %s4046_s24 = smov (!%p166_p10, %s2052_s24), 63  ;;  %2128 = vmatpush3.bf16.msra.mxu0 %v2304_v31  ;;  %v2311_v47 = vld [vmem:[%s3930_s1 + $0x38] sm:$0xff]   ;;  %s3720_s8 = scalar_lea.vmem [#allocation2], %s2051_s7 }
  0x19   : > { %s2053_s25 = sshll.u32 %s4046_s24, 3  ;;  %2129 = vmatprep.subr.bf16.mxu0 %v2305_v32  ;;  %s1985_s10 = sshll.u32 %s3720_s8, 4  ;;  %s3879_s10 = int_to_ptr.vmem [resolvable:$true] %s1985_s10 }
  0x1a   : > { %s2593_s28 = scalar_lea.vmem %s3929_s0, %s2053_s25  ;;  %s3877_s16 = scalar_lea.hbm %s3932_s3, %s2078_s9 }
  0x1b   : > { %v175_v1 = vld [vmem:[%s2593_s28 + $0x10] sm:$0xff]  ;;  %v2597_v2 = vld [vmem:[%s2593_s28] sm:$0xff]  ;;  %v2601_v3 = vld [vmem:[%s2593_s28 + $0x18] sm:$0xff]  ;;  %s3888_s19 = scalar_lea.sflag [#allocation3], %s162_s6  ;;  %s2448_s20 = scalar_lea.vmem %s3879_s10, 4096 }
  0x1c   : > { %253 = vperm.xlu1 %2269, %v175_v1   ;;  %243 = vperm.xlu0 %2268, %v2597_v2   ;;  %v2604_v4 = vld [vmem:[%s2593_s28 + $0x8] sm:$0xff]  ;;  %v2646_v15 = vld [vmem:[%s2593_s28 + $0x20] sm:$0xff]  ;;  %v179_v16 = vld [vmem:[%s2593_s28 + $0x30] sm:$0xff]  ;;  %p2449_p11 = scmp.ne.s32.totalorder %s3879_s10, %s2448_s20  ;;  %s2516_s24 = smov [#allocation2]  }
  0x1d   : > { %v2609_v5 = vld [vmem:[%s2593_s28 + $0x28] sm:$0xff]  ;;  %v2654_v17 = vld [vmem:[%s2593_s28 + $0x38] sm:$0xff]  ;;  %v2659_v18 = vld [vmem:[%s2593_s28 + $0x40] sm:$0xff]  ;;  %2130 = vmatpush3.bf16.msra.mxu0 %v2305_v32  ;;  %s2452_s25 = sshll.u32 %s2516_s24, 4  ;;  %s2453_s25 = int_to_ptr.vmem [resolvable:$false] %s2452_s25 }
  0x1e   : > { %v2614_v7 = vld [vmem:[%s2593_s28 + $0x48] sm:$0xff]  ;;  %v2665_v19 = vld [vmem:[%s2593_s28 + $0x58] sm:$0xff]  ;;  %v2669_v20 = vld [vmem:[%s2593_s28 + $0x60] sm:$0xff]  ;;  %2131 = vmatprep.subr.bf16.mxu0 %v2306_v33  ;;  %p2450_p12 = pnand %p2449_p11, %p2577_p5  ;;  %s2454_s26 = scalar_lea.vmem %s2453_s25, 8192 }
  0x1f   : > { %v2618_v8 = vld [vmem:[%s2593_s28 + $0x68] sm:$0xff]  ;;  %v2675_v21 = vld [vmem:[%s2593_s28 + $0x78] sm:$0xff]  ;;  %v2679_v22 = vld [vmem:[%s2593_s28 + $0x80] sm:$0xff]  ;;  %p2455_p0 = scmp.lt.s32.totalorder %s3879_s10, %s2453_s25  ;;  %p2456_p1 = scmp.lt.s32.totalorder %s2454_s26, %s2448_s20 }
  0x20   : > { %258 = vperm.xlu1 %2269, %v2601_v3   ;;  %248 = vperm.xlu0 %2268, %v2604_v4   ;;  %v2624_v10 = vld [vmem:[%s2593_s28 + $0x88] sm:$0xff]  ;;  %v2684_v23 = vld [vmem:[%s2593_s28 + $0x98] sm:$0xff]  ;;  %v2689_v24 = vld [vmem:[%s2593_s28 + $0xa0] sm:$0xff]  ;;  %p2451_p13 = pneg %p2450_p12 }
  0x21   : > { %v2629_v11 = vld [vmem:[%s2593_s28 + $0xa8] sm:$0xff]  ;;  %v2694_v25 = vld [vmem:[%s2593_s28 + $0xb8] sm:$0xff]  ;;  %v2698_v26 = vld [vmem:[%s2593_s28 + $0xc0] sm:$0xff]  ;;  %2132 = vmatpush3.bf16.msra.mxu0 %v2306_v33  ;;  %p2457_p2 = por %p2456_p1, %p2455_p0 }
  0x22   : > { %v2633_v12 = vld [vmem:[%s2593_s28 + $0xc8] sm:$0xff]  ;;  %v183_v27 = vld [vmem:[%s2593_s28 + $0x50] sm:$0xff]  ;;  %v2705_v28 = vld [vmem:[%s2593_s28 + $0xd8] sm:$0xff]  ;;  %2133 = vmatprep.subr.bf16.mxu0 %v2307_v34 }
  0x23   : > { %v2638_v13 = vld [vmem:[%s2593_s28 + $0xe8] sm:$0xff]  ;;  %v2709_v29 = vld [vmem:[%s2593_s28 + $0xe0] sm:$0xff]  ;;  %v2714_v30 = vld [vmem:[%s2593_s28 + $0xf8] sm:$0xff]  ;;  %p2458_p3 = pnand %p2457_p2, %p2451_p13 }
  0x24   : > { %2270 = vset.pattern.permute.xlu1 %v3939_v6  ;;  %268 = vperm.xlu0 %2268, %v2609_v5   ;;  %3964 = vst [vmem:[#allocation5_spill] sm:$0xff] %v2638_v13  ;;  %3965 = vst [vmem:[#allocation6_spill] sm:$0xff] %v2709_v29  ;;  %v187_v37 = vld [vmem:[%s2593_s28 + $0x70] sm:$0xff] }
  0x25   : > { %478 = vperm.xlu1 %2270, %v2604_v4   ;;  %3966 = vst [vmem:[#allocation7_spill] sm:$0xff] %v2714_v30  ;;  %2134 = vmatpush3.bf16.msra.mxu0 %v2307_v34  ;;  %v191_v63 = vld [vmem:[%s2593_s28 + $0x90] sm:$0xff] }
  0x26   : > { %2135 = vmatprep.subr.bf16.mxu0 %v2308_v38 }
  0x28   : > { %288 = vperm.xlu0 %2268, %v2614_v7  }
  0x29   : > { %482 = vperm.xlu1 %2270, %v175_v1   ;;  %2136 = vmatpush3.bf16.msra.mxu0 %v2308_v38 }
  0x2a   : > { %2137 = vmatprep.subr.bf16.mxu0 %v2309_v41 }
  0x2c   : > { %308 = vperm.xlu0 %2268, %v2618_v8  }
  0x2d   : > { %2271 = vset.pattern.permute.xlu1 %v3937_v9  ;;  %2138 = vmatpush3.bf16.msra.mxu0 %v2309_v41 }
  0x2e   : > { %670 = vperm.xlu1 %2271, %v2597_v2   ;;  %2139 = vmatprep.subr.bf16.mxu0 %v2310_v44 }
  0x30   : > { %328 = vperm.xlu0 %2268, %v2624_v10  }
  0x31   : > { %2140 = vmatpush3.bf16.msra.mxu0 %v2310_v44 }
  0x32   : > { %678 = vperm.xlu1 %2271, %v175_v1   ;;  %2141 = vmatprep.subr.bf16.mxu0 %v2311_v47 }
  0x34   : > { %348 = vperm.xlu0 %2268, %v2629_v11  }
  0x35   : > { %2142 = vmatpush3.bf16.msra.mxu0 %v2311_v47 }
  0x36   : > { %682 = vperm.xlu1 %2271, %v2601_v3  }
  0x38   : > { %368 = vperm.xlu0 %2268, %v2633_v12  }
  0x3a   : > { %2272 = vset.pattern.permute.xlu1 %v3935_v14 }
  0x3b   : > { %870 = vperm.xlu1 %2272, %v2604_v4  }
  0x3c   : > { %388 = vperm.xlu0 %2268, %v2638_v13  }
  0x3f   : > { %874 = vperm.xlu1 %2272, %v175_v1  }
  0x40   : > { %2298 = vset.pattern.permute.xlu0 %v3939_v6 }
  0x41   : > { %474 = vperm.xlu0 %2298, %v2597_v2  }
  0x43   : > { %2273 = vset.pattern.permute.xlu1 %v3933_v0 }
  0x44   : > { %263 = vperm.xlu1 %2273, %v2646_v15  }
  0x45   : > { %486 = vperm.xlu0 %2298, %v2601_v3  }
  0x48   : > { %273 = vperm.xlu1 %2273, %v179_v16  }
  0x49   : > { %490 = vperm.xlu0 %2298, %v2646_v15  }
  0x4c   : > { %278 = vperm.xlu1 %2273, %v2654_v17  }
  0x4d   : > { %502 = vperm.xlu0 %2298, %v2654_v17  }
  0x50   : > { %2274 = vset.pattern.permute.xlu1 %v3939_v6 }
  0x51   : > { %494 = vperm.xlu1 %2274, %v2609_v5   ;;  %506 = vperm.xlu0 %2298, %v2659_v18  }
  0x55   : > { %498 = vperm.xlu1 %2274, %v179_v16   ;;  %518 = vperm.xlu0 %2298, %v2665_v19  }
  0x59   : > { %2275 = vset.pattern.permute.xlu1 %v3937_v9  ;;  %522 = vperm.xlu0 %2298, %v2669_v20  }
  0x5a   : > { %686 = vperm.xlu1 %2275, %v2646_v15  }
  0x5d   : > { %534 = vperm.xlu0 %2298, %v2675_v21  }
  0x5e   : > { %694 = vperm.xlu1 %2275, %v179_v16  }
  0x61   : > { %538 = vperm.xlu0 %2298, %v2679_v22  }
  0x62   : > { %698 = vperm.xlu1 %2275, %v2654_v17  }
  0x65   : > { %550 = vperm.xlu0 %2298, %v2684_v23  }
  0x66   : > { %2276 = vset.pattern.permute.xlu1 %v3935_v14 }
  0x67   : > { %886 = vperm.xlu1 %2276, %v2609_v5  }
  0x69   : > { %554 = vperm.xlu0 %2298, %v2689_v24  }
  0x6b   : > { %890 = vperm.xlu1 %2276, %v179_v16  }
  0x6d   : > { %566 = vperm.xlu0 %2298, %v2694_v25  }
  0x6f   : > { %2277 = vset.pattern.permute.xlu1 %v3933_v0 }
  0x70   : > { %283 = vperm.xlu1 %2277, %v2659_v18  }
  0x71   : > { %570 = vperm.xlu0 %2298, %v2698_v26  }
  0x74   : > { %293 = vperm.xlu1 %2277, %v183_v27  }
  0x75   : > { %582 = vperm.xlu0 %2298, %v2705_v28  }
  0x78   : > { %298 = vperm.xlu1 %2277, %v2665_v19  }
  0x79   : > { %586 = vperm.xlu0 %2298, %v2709_v29  }
  0x7c   : > { %2278 = vset.pattern.permute.xlu1 %v3939_v6 }
  0x7d   : > { %510 = vperm.xlu1 %2278, %v2614_v7   ;;  %598 = vperm.xlu0 %2298, %v2714_v30  }
  0x81   : > { %514 = vperm.xlu1 %2278, %v183_v27   ;;  %2300 = vset.pattern.permute.xlu0 %v3937_v9 }
  0x82   : > { %674 = vperm.xlu0 %2300, %v2604_v4  }
  0x85   : > { %2279 = vset.pattern.permute.xlu1 %v3937_v9 }
  0x86   : > { %702 = vperm.xlu1 %2279, %v2659_v18   ;;  %690 = vperm.xlu0 %2300, %v2609_v5  }
  0x8a   : > { %710 = vperm.xlu1 %2279, %v183_v27   ;;  %706 = vperm.xlu0 %2300, %v2614_v7  }
  0x8e   : > { %714 = vperm.xlu1 %2279, %v2665_v19   ;;  %722 = vperm.xlu0 %2300, %v2618_v8  }
  0x92   : > { %2280 = vset.pattern.permute.xlu1 %v3935_v14  ;;  %738 = vperm.xlu0 %2300, %v2624_v10  }
  0x93   : > { %902 = vperm.xlu1 %2280, %v2614_v7  }
  0x96   : > { %754 = vperm.xlu0 %2300, %v2629_v11  }
  0x97   : > { %906 = vperm.xlu1 %2280, %v183_v27  }
  0x9a   : > { %770 = vperm.xlu0 %2300, %v2633_v12  }
  0x9b   : > { %v2744_v35 = vpop.permute.xlu1 %253  ;;  %2281 = vset.pattern.permute.xlu1 %v3933_v0  ;;  %v2747_v36 = vpop.permute.xlu0 %243 }
  0x9c   : > { %303 = vperm.xlu1 %2281, %v2669_v20  }
  0x9e   : > { %786 = vperm.xlu0 %2300, %v2638_v13  }
  0x9f   : > { %v2755_v39 = vpop.permute.xlu1 %258  ;;  %v2757_v40 = vpop.permute.xlu0 %248 }
  0xa0   : > { %313 = vperm.xlu1 %2281, %v187_v37  }
  0xa2   : > { %2302 = vset.pattern.permute.xlu0 %v3935_v14 }
  0xa3   : > { %866 = vperm.xlu0 %2302, %v2597_v2   ;;  %v2764_v42 = vpop.permute.xlu0 %268 }
  0xa4   : > { %v2766_v43 = vpop.permute.xlu1 %478  ;;  %318 = vperm.xlu1 %2281, %v2675_v21  }
  0xa7   : > { %878 = vperm.xlu0 %2302, %v2601_v3   ;;  %v2773_v45 = vpop.permute.xlu0 %288 }
  0xa8   : > { %v2775_v46 = vpop.permute.xlu1 %482  ;;  %2282 = vset.pattern.permute.xlu1 %v3939_v6 }
  0xa9   : > { %526 = vperm.xlu1 %2282, %v2618_v8  }
  0xab   : > { %882 = vperm.xlu0 %2302, %v2646_v15   ;;  %v2783_v48 = vpop.permute.xlu0 %308 }
  0xad   : > { %530 = vperm.xlu1 %2282, %v187_v37   ;;  %v2785_v49 = vpop.permute.xlu1 %670 }
  0xaf   : > { %894 = vperm.xlu0 %2302, %v2654_v17   ;;  %v2788_v50 = vpop.permute.xlu0 %328 }
  0xb0   : > { %3967 = vst [vmem:[#allocation8_spill] sm:$0xff] %v2788_v50 }
  0xb1   : > { %2283 = vset.pattern.permute.xlu1 %v3937_v9  ;;  %v2791_v51 = vpop.permute.xlu1 %678 }
  0xb2   : > { %718 = vperm.xlu1 %2283, %v2669_v20  }
  0xb3   : > { %898 = vperm.xlu0 %2302, %v2659_v18   ;;  %v2795_v52 = vpop.permute.xlu0 %348 }
  0xb4   : > { %3968 = vst [vmem:[#allocation9_spill] sm:$0xff] %v2795_v52 }
  0xb5   : > { %v2797_v53 = vpop.permute.xlu1 %682 }
  0xb6   : > { %726 = vperm.xlu1 %2283, %v187_v37  }
  0xb7   : > { %910 = vperm.xlu0 %2302, %v2665_v19   ;;  %v2800_v54 = vpop.permute.xlu0 %368 }
  0xb8   : > { %3969 = vst [vmem:[#allocation10_spill] sm:$0xff] %v2800_v54 }
  0xba   : > { %730 = vperm.xlu1 %2283, %v2675_v21   ;;  %v2803_v55 = vpop.permute.xlu1 %870 }
  0xbb   : > { %914 = vperm.xlu0 %2302, %v2669_v20   ;;  %v2806_v56 = vpop.permute.xlu0 %388 }
  0xbc   : > { %3970 = vst [vmem:[#allocation11_spill] sm:$0xff] %v2806_v56 }
  0xbe   : > { %2284 = vset.pattern.permute.xlu1 %v3935_v14  ;;  %v2809_v57 = vpop.permute.xlu1 %874 }
  0xbf   : > { %918 = vperm.xlu1 %2284, %v2618_v8   ;;  %926 = vperm.xlu0 %2302, %v2675_v21  }
  0xc0   : > { %v2813_v58 = vpop.permute.xlu0 %474 }
  0xc3   : > { %922 = vperm.xlu1 %2284, %v187_v37   ;;  %v2815_v59 = vpop.permute.xlu1 %263  ;;  %930 = vperm.xlu0 %2302, %v2679_v22   ;;  %v195_v37 = vld [vmem:[%s2593_s28 + $0xb0] sm:$0xff] }
  0xc4   : > { %v2818_v60 = vpop.permute.xlu0 %486 }
  0xc7   : > { %2285 = vset.pattern.permute.xlu1 %v3933_v0  ;;  %v2821_v61 = vpop.permute.xlu1 %273  ;;  %942 = vperm.xlu0 %2302, %v2684_v23  }
  0xc8   : > { %323 = vperm.xlu1 %2285, %v2679_v22   ;;  %v2825_v62 = vpop.permute.xlu0 %490 }
  0xcb   : > { %v2828_v1 = vpop.permute.xlu1 %278  ;;  %946 = vperm.xlu0 %2302, %v2689_v24  }
  0xcc   : > { %333 = vperm.xlu1 %2285, %v191_v63   ;;  %v2831_v2 = vpop.permute.xlu0 %502 }
  0xcf   : > { %958 = vperm.xlu0 %2302, %v2694_v25  }
  0xd0   : > { %338 = vperm.xlu1 %2285, %v2684_v23   ;;  %v2835_v3 = vpop.permute.xlu1 %494  ;;  %v2837_v4 = vpop.permute.xlu0 %506 }
  0xd3   : > { %962 = vperm.xlu0 %2302, %v2698_v26  }
  0xd4   : > { %2286 = vset.pattern.permute.xlu1 %v3939_v6  ;;  %v2841_v5 = vpop.permute.xlu1 %498  ;;  %v2843_v7 = vpop.permute.xlu0 %518 }
  0xd5   : > { %542 = vperm.xlu1 %2286, %v2624_v10  }
  0xd7   : > { %974 = vperm.xlu0 %2302, %v2705_v28  }
  0xd8   : > { %v2847_v8 = vpop.permute.xlu0 %522 }
  0xd9   : > { %3971 = vst [vmem:[#allocation12_spill] sm:$0xff] %v2847_v8  ;;  %546 = vperm.xlu1 %2286, %v191_v63   ;;  %v2849_v15 = vpop.permute.xlu1 %686 }
  0xdb   : > { %978 = vperm.xlu0 %2302, %v2709_v29   ;;  %v3985_v29 = vmov 3  }
  0xdc   : > { %v2852_v16 = vpop.permute.xlu0 %534 }
  0xdd   : > { %3972 = vst [vmem:[#allocation13_spill] sm:$0xff] %v2852_v16  ;;  %2287 = vset.pattern.permute.xlu1 %v3937_v9  ;;  %v2855_v17 = vpop.permute.xlu1 %694  ;;  %v3941_v9 = vlaneseq }
  0xde   : > { %734 = vperm.xlu1 %2287, %v2679_v22  }
  0xdf   : > { %990 = vperm.xlu0 %2302, %v2714_v30  }
  0xe0   : > { %v2859_v18 = vpop.permute.xlu0 %538 }
  0xe1   : > { %3973 = vst [vmem:[#allocation14_spill] sm:$0xff] %v2859_v18  ;;  %v2861_v19 = vpop.permute.xlu1 %698 }
  0xe2   : > { %742 = vperm.xlu1 %2287, %v191_v63  }
  0xe4   : > { %v2863_v20 = vpop.permute.xlu0 %550 }
  0xe5   : > { %3974 = vst [vmem:[#allocation15_spill] sm:$0xff] %v2863_v20 }
  0xe6   : > { %746 = vperm.xlu1 %2287, %v2684_v23   ;;  %v2866_v21 = vpop.permute.xlu1 %886 }
  0xe8   : > { %v2868_v27 = vpop.permute.xlu0 %554 }
  0xe9   : > { %3975 = vst [vmem:[#allocation16_spill] sm:$0xff] %v2868_v27 }
  0xea   : > { %2288 = vset.pattern.permute.xlu1 %v3935_v14  ;;  %v2871_v31 = vpop.permute.xlu1 %890 }
  0xeb   : > { %934 = vperm.xlu1 %2288, %v2624_v10  }
  0xec   : > { %v2874_v22 = vpop.permute.xlu0 %566 }
  0xed   : > { %3976 = vst [vmem:[#allocation17_spill] sm:$0xff] %v2874_v22  ;;  %v205_v22 = vld [vmem:[%s3931_s2] sm:$0xff] }
  0xef   : > { %938 = vperm.xlu1 %2288, %v191_v63   ;;  %v2876_v32 = vpop.permute.xlu1 %283 }
  0xf0   : > { %v2878_v33 = vpop.permute.xlu0 %570 }
  0xf1   : > { %3977 = vst [vmem:[#allocation18_spill] sm:$0xff] %v2878_v33 }
  0xf3   : > { %2289 = vset.pattern.permute.xlu1 %v3933_v0  ;;  %v2881_v23 = vpop.permute.xlu1 %293 }
  0xf4   : > { %343 = vperm.xlu1 %2289, %v2689_v24   ;;  %v2884_v34 = vpop.permute.xlu0 %582 }
  0xf5   : > { %3978 = vst [vmem:[#allocation19_spill] sm:$0xff] %v2884_v34 }
  0xf7   : > { %v2887_v38 = vpop.permute.xlu1 %298 }
  0xf8   : > { %353 = vperm.xlu1 %2289, %v195_v37   ;;  %v2889_v10 = vpop.permute.xlu0 %586 }
  0xf9   : > { %3979 = vst [vmem:[#allocation20_spill] sm:$0xff] %v2889_v10  ;;  %v3981_v10 = vmov 2  }
  0xfc   : > { %358 = vperm.xlu1 %2289, %v2694_v25   ;;  %v2892_v41 = vpop.permute.xlu1 %510  ;;  %v2894_v44 = vpop.permute.xlu0 %598 }
  0xfd   : > { %3980 = vst [vmem:[#allocation21_spill] sm:$0xff] %v2894_v44  ;;  %v402_v44 = vshrl.u32 %v3941_v9, 7 }
  0xff   : > { %v403_v54 = vsub.s32 0, %v402_v44  ;;  %v603_v27 = vsub.s32 1, %v402_v44  ;;  %v799_v18 = vsub.s32 2, %v402_v44 }
 0x100   : > { %2290 = vset.pattern.permute.xlu1 %v3939_v6  ;;  %v2897_v47 = vpop.permute.xlu1 %514 }
 0x101   : > { %558 = vperm.xlu1 %2290, %v2629_v11   ;;  %v675_v63 = vpop.permute.xlu0 %674  ;;  %v2920_v20 = vrot.slane %v205_v22, %v403_v54  ;;  %v2927_v50 = vrot.slane %v205_v22, %v603_v27  ;;  %v995_v54 = vsub.s32 3, %v402_v44  ;;  %v2949_v44 = vrot.slane %v205_v22, %v799_v18 }
 0x103   : > { %v407_v30 = vmul.f32 %v2920_v20, %v2744_v35  ;;  %v606_v35 = vmul.f32 %v2927_v50, %v2766_v43  ;;  %v2955_v16 = vrot.slane %v205_v22, %v995_v54  ;;  %v605_v43 = vmul.f32 %v2927_v50, %v2813_v58 }
 0x104   : > { %v608_v58 = vmul.f32 %v2927_v50, %v2818_v60  ;;  %v412_v60 = vmul.f32 %v2920_v20, %v2828_v1  ;;  %v804_v1 = vmul.f32 %v2949_v44, %v2797_v53  ;;  %v612_v53 = vmul.f32 %v2927_v50, %v2831_v2 }
 0x105   : > { %562 = vperm.xlu1 %2290, %v195_v37   ;;  %v2900_v0 = vpop.permute.xlu1 %702  ;;  %v2902_v14 = vpop.permute.xlu0 %690 }
 0x109   : > { %2291 = vset.pattern.permute.xlu1 %v3981_v10  ;;  %v2905_v56 = vpop.permute.xlu1 %710  ;;  %v2907_v34 = vpop.permute.xlu0 %706 }
 0x10a   : > { %750 = vperm.xlu1 %2291, %v2689_v24   ;;  %v406_v24 = vmul.f32 %v2920_v20, %v2757_v40  ;;  %v2941_v40 = vld [vmem:[%s3931_s2 + $0x8] ss:$0 sm:$0xff] }
 0x10c   : > { %v442_v27 = vadd.f32 %v2941_v40, %v406_v24  ;;  %v803_v24 = vmul.f32 %v2949_v44, %v2791_v51 }
 0x10d   : > { %v2911_v6 = vpop.permute.xlu1 %714  ;;  %v2913_v33 = vpop.permute.xlu0 %722 }
 0x10e   : > { %3982 = vst [vmem:[#allocation22_spill] sm:$0xff] %v2913_v33  ;;  %758 = vperm.xlu1 %2291, %v195_v37   ;;  %v638_v22 = vadd.f32 %v606_v35, %v442_v27  ;;  %v409_v35 = vmul.f32 %v2920_v20, %v2815_v59  ;;  %v806_v59 = vmul.f32 %v2949_v44, %v2902_v14 }
 0x111   : > { %v2918_v52 = vpop.permute.xlu0 %738 }
 0x112   : > { %3983 = vst [vmem:[#allocation23_spill] sm:$0xff] %v2918_v52  ;;  %762 = vperm.xlu1 %2291, %v2694_v25   ;;  %v2923_v9 = vpop.permute.xlu1 %902  ;;  %v405_v52 = vmul.f32 %v2920_v20, %v2747_v36  ;;  %v607_v36 = vmul.f32 %v2927_v50, %v2775_v46  ;;  %v802_v46 = vmul.f32 %v2949_v44, %v675_v63 }
 0x114   : > { %v441_v33 = vadd.f32 %v2941_v40, %v405_v52  ;;  %v414_v52 = vmul.f32 %v2920_v20, %v2773_v45  ;;  %v834_v10 = vadd.f32 %v802_v46, %v638_v22  ;;  %v448_v22 = vadd.f32 %v2941_v40, %v412_v60 }
 0x115   : > { %v2929_v13 = vpop.permute.xlu0 %754 }
 0x116   : > { %3984 = vst [vmem:[#allocation24_spill] sm:$0xff] %v2929_v13  ;;  %2292 = vset.pattern.permute.xlu1 %v3985_v29  ;;  %v2936_v25 = vpop.permute.xlu1 %906  ;;  %v443_v29 = vadd.f32 %v2941_v40, %v407_v30  ;;  %v410_v30 = vmul.f32 %v2920_v20, %v2764_v42  ;;  %v3987_v42 = vmov 0   ;;  %v2982_v45 = vadd.f32 %v2941_v40, %v414_v52 }
 0x117   : > { %950 = vperm.xlu1 %2292, %v2629_v11   ;;  %v408_v11 = vmul.f32 %v2920_v20, %v2755_v39  ;;  %v999_v39 = vmul.f32 %v2955_v16, %v2809_v57  ;;  %v801_v57 = vmul.f32 %v2949_v44, %v2785_v49  ;;  %v3002_v49 = vmul.f32 %v2920_v20, %v2783_v48 }
 0x118   : > { %v639_v54 = vadd.f32 %v607_v36, %v443_v29  ;;  %v446_v29 = vadd.f32 %v2941_v40, %v410_v30  ;;  %v610_v36 = vmul.f32 %v2927_v50, %v2835_v3  ;;  %v609_v48 = vmul.f32 %v2927_v50, %v2825_v62 }
 0x119   : > { %v2951_v13 = vpop.permute.xlu0 %770  ;;  %v805_v62 = vmul.f32 %v2949_v44, %v2849_v15  ;;  %v1003_v15 = vmul.f32 %v2955_v16, %v2871_v31 }
 0x11a   : > { %3986 = vst [vmem:[#allocation25_spill] sm:$0xff] %v2951_v13  ;;  %v835_v63 = vadd.f32 %v803_v24, %v639_v54  ;;  %v637_v13 = vadd.f32 %v605_v43, %v441_v33  ;;  %v998_v33 = vmul.f32 %v2955_v16, %v2803_v55  ;;  %v411_v55 = vmul.f32 %v2920_v20, %v2821_v61 }
 0x11b   : > { %954 = vperm.xlu1 %2292, %v195_v37   ;;  %v2964_v18 = vpop.permute.xlu1 %303  ;;  %v444_v37 = vadd.f32 %v2941_v40, %v408_v11  ;;  %v2998_v11 = vld [vmem:[%s2593_s28 + $0xd0] sm:$0xff]  ;;  %v611_v61 = vmul.f32 %v2927_v50, %v2841_v5  ;;  %v445_v54 = vadd.f32 %v2941_v40, %v409_v35 }
 0x11c   : > { %v2991_v27 = vadd.f32 %v999_v39, %v835_v63  ;;  %v833_v30 = vadd.f32 %v801_v57, %v637_v13  ;;  %v1030_v52 = vadd.f32 %v998_v33, %v834_v10  ;;  %v642_v39 = vadd.f32 %v610_v36, %v446_v29 }
 0x11d   : > { %v2972_v51 = vpop.permute.xlu0 %786  ;;  %v640_v24 = vadd.f32 %v608_v58, %v444_v37  ;;  %v447_v10 = vadd.f32 %v2941_v40, %v411_v55  ;;  %v807_v58 = vmul.f32 %v2949_v44, %v2855_v17  ;;  %v641_v33 = vadd.f32 %v609_v48, %v445_v54 }
 0x11e   : > { %v1063_v14 = vmax.f32 %v2991_v27, 0.0  ;;  %v838_v63 = vadd.f32 %v806_v59, %v642_v39  ;;  %v1062_v60 = vmax.f32 %v1030_v52, 0.0  ;;  %v644_v27 = vadd.f32 %v612_v53, %v448_v22 }
 0x11f   : > { %2293 = vset.pattern.permute.xlu1 %v3987_v42  ;;  %v2978_v8 = vpop.permute.xlu1 %313  ;;  %v836_v2 = vadd.f32 %v804_v1, %v640_v24  ;;  %v643_v35 = vadd.f32 %v611_v61, %v447_v10  ;;  %v1002_v29 = vmul.f32 %v2955_v16, %v2866_v21  ;;  %v413_v17 = vmul.f32 %v2920_v20, %v2876_v32 }
 0x120   : > { %363 = vperm.xlu1 %2293, %v2698_v26   ;;  %v613_v55 = vmul.f32 %v2927_v50, %v2837_v4  ;;  %v808_v59 = vmul.f32 %v2949_v44, %v2861_v19  ;;  %v614_v21 = vmul.f32 %v2927_v50, %v2892_v41  ;;  %v616_v32 = vmul.f32 %v2927_v50, %v2843_v7 }
 0x121   : > { %v1034_v52 = vadd.f32 %v1002_v29, %v838_v63  ;;  %v415_v4 = vmul.f32 %v2920_v20, %v2881_v23  ;;  %v416_v22 = vmul.f32 %v2920_v20, %v2887_v38  ;;  %v810_v19 = vmul.f32 %v2949_v44, %v2907_v34 }
 0x122   : > { %v867_v43 = vpop.permute.xlu0 %866  ;;  %v3988_v41 = vmov 1   ;;  %v449_v54 = vadd.f32 %v2941_v40, %v413_v17  ;;  %v646_v23 = vadd.f32 %v614_v21, %v2982_v45  ;;  %v615_v38 = vmul.f32 %v2927_v50, %v2897_v47  ;;  %v3989_v21 = vld [vmem:[#allocation12_spill] sm:$0xff] }
 0x123   : > { %v997_v46 = vmul.f32 %v2955_v16, %v867_v43  ;;  %v3011_v3 = vpop.permute.xlu1 %318  ;;  %v837_v43 = vadd.f32 %v805_v62, %v641_v33  ;;  %v1006_v34 = vmul.f32 %v2955_v16, %v2923_v9  ;;  %v809_v62 = vmul.f32 %v2949_v44, %v2900_v0 }
 0x124   : > { %373 = vperm.xlu1 %2293, %v2998_v11   ;;  %v452_v63 = vadd.f32 %v2941_v40, %v416_v22  ;;  %v811_v45 = vmul.f32 %v2949_v44, %v2905_v56  ;;  %v842_v47 = vadd.f32 %v810_v19, %v646_v23  ;;  %v1007_v29 = vmul.f32 %v2955_v16, %v2936_v25 }
 0x125   : > { %v1029_v13 = vadd.f32 %v997_v46, %v833_v30  ;;  %v839_v30 = vadd.f32 %v807_v58, %v643_v35  ;;  %v417_v56 = vmul.f32 %v2920_v20, %v2964_v18 }
 0x126   : > { %v879_v37 = vpop.permute.xlu0 %878  ;;  %v1038_v35 = vadd.f32 %v1006_v34, %v842_v47 }
 0x127   : > { %v1000_v5 = vmul.f32 %v2955_v16, %v879_v37  ;;  %v1061_v57 = vmax.f32 %v1029_v13, 0.0  ;;  %v1035_v61 = vadd.f32 %v1003_v15, %v839_v30  ;;  %v840_v13 = vadd.f32 %v808_v59, %v644_v27 }
 0x128   : > { %378 = vperm.xlu1 %2293, %v2705_v28   ;;  %v3032_v36 = vpop.permute.xlu1 %526  ;;  %v1066_v37 = vmax.f32 %v1034_v52, 0.0  ;;  %v812_v27 = vmul.f32 %v2949_v44, %v2911_v6  ;;  %v454_v59 = vadd.f32 %v2941_v40, %v3002_v49  ;;  %v617_v6 = vmul.f32 %v2927_v50, %v3989_v21 }
 0x129   : > { %v1032_v1 = vadd.f32 %v1000_v5, %v836_v2  ;;  %v1093_v24 = vpack.c.bf16 %v1062_v60, %v1061_v57  ;;  %v1067_v5 = vmax.f32 %v1035_v61, 0.0  ;;  %v645_v57 = vadd.f32 %v613_v55, %v449_v54  ;;  %v3991_v54 = vld [vmem:[#allocation13_spill] sm:$0xff] }
 0x12a   : > { %v883_v46 = vpop.permute.xlu0 %882  ;;  %v3990_v30 = vmov 2   ;;  %v453_v22 = vadd.f32 %v2941_v40, %v417_v56  ;;  %v618_v49 = vmul.f32 %v2927_v50, %v3032_v36 }
 0x12b   : > { %v1064_v48 = vmax.f32 %v1032_v1, 0.0  ;;  %v1001_v31 = vmul.f32 %v2955_v16, %v883_v46  ;;  %2143 = vmatprep.mubr.bf16.mxu0 %v1093_v24  ;;  %v841_v17 = vadd.f32 %v809_v62, %v645_v57 }
 0x12c   : > { %2294 = vset.pattern.permute.xlu1 %v3988_v41  ;;  %v3054_v53 = vpop.permute.xlu1 %530 }
 0x12d   : > { %v1033_v39 = vadd.f32 %v1001_v31, %v837_v43  ;;  %574 = vperm.xlu1 %2294, %v2633_v12   ;;  %v1094_v7 = vpack.c.bf16 %v1064_v48, %v1063_v14  ;;  %v451_v14 = vadd.f32 %v2941_v40, %v415_v4  ;;  %v648_v43 = vadd.f32 %v616_v32, %v452_v63 }
 0x12e   : > { %v895_v10 = vpop.permute.xlu0 %894  ;;  %v1070_v31 = vmax.f32 %v1038_v35, 0.0  ;;  %v420_v4 = vmul.f32 %v2920_v20, %v3011_v3  ;;  %v619_v63 = vmul.f32 %v2927_v50, %v3054_v53 }
 0x12f   : > { %v1065_v58 = vmax.f32 %v1033_v39, 0.0  ;;  %v1004_v2 = vmul.f32 %v2955_v16, %v895_v10  ;;  %2144 = vmatmul.mubr.bf16.vlgmr.msra.gmra.mrb[0].mxu0 %v1094_v7  ;;  %v647_v33 = vadd.f32 %v615_v38, %v451_v14  ;;  %v844_v48 = vadd.f32 %v812_v27, %v648_v43  ;;  %v3992_v38 = vld [vmem:[#allocation22_spill] sm:$0xff] }
 0x130   : > { %v620_v39 = vmul.f32 %v2927_v50, %v3991_v54  ;;  %v419_v10 = vmul.f32 %v2920_v20, %v2978_v8  ;;  %v456_v36 = vadd.f32 %v2941_v40, %v420_v4  ;;  %v3115_v4 = vld [vmem:[%s2593_s28 + $0xf0] sm:$0xff] }
 0x131   : > { %v1036_v9 = vadd.f32 %v1004_v2, %v840_v13  ;;  %578 = vperm.xlu1 %2294, %v2998_v11   ;;  %v719_v60 = vpop.permute.xlu1 %718  ;;  %v1095_v0 = vpack.c.bf16 %v1066_v37, %v1065_v58  ;;  %v843_v55 = vadd.f32 %v811_v45, %v647_v33  ;;  %v650_v58 = vadd.f32 %v618_v49, %v454_v59  ;;  %v3996_v49 = vld [vmem:[#allocation5_spill] sm:$0xff] }
 0x132   : > { %v899_v15 = vpop.permute.xlu0 %898  ;;  %v813_v7 = vmul.f32 %v2949_v44, %v719_v60  ;;  %v649_v2 = vadd.f32 %v617_v6, %v453_v22  ;;  %v455_v8 = vadd.f32 %v2941_v40, %v419_v10 }
 0x133   : > { %v1068_v1 = vmax.f32 %v1036_v9, 0.0  ;;  %v1005_v24 = vmul.f32 %v2955_v16, %v899_v15  ;;  %2147 = vmatprep.mubr.bf16.mxu0 %v1095_v0  ;;  %v1039_v18 = vadd.f32 %v1007_v29, %v843_v55  ;;  %v652_v9 = vadd.f32 %v620_v39, %v456_v36  ;;  %v3999_v36 = vld [vmem:[#allocation15_spill] sm:$0xff] }
 0x134   : > { %v845_v45 = vadd.f32 %v813_v7, %v649_v2  ;;  %v651_v53 = vadd.f32 %v619_v63, %v455_v8  ;;  %v3998_v7 = vld [vmem:[#allocation8_spill] sm:$0xff]  ;;  %v4000_v63 = vld [vmem:[#allocation23_spill] sm:$0xff] }
 0x135   : > { %v1037_v46 = vadd.f32 %v1005_v24, %v841_v17  ;;  %2295 = vset.pattern.permute.xlu1 %v3990_v30  ;;  %v727_v25 = vpop.permute.xlu1 %726  ;;  %v1096_v52 = vpack.c.bf16 %v1068_v1, %v1067_v5  ;;  %v1071_v34 = vmax.f32 %v1039_v18, 0.0  ;;  %v3993_v1 = vmov 3   ;;  %v3994_v18 = vld [vmem:[#allocation6_spill] sm:$0xff] }
 0x136   : > { %766 = vperm.xlu1 %2295, %v2698_v26   ;;  %v911_v32 = vpop.permute.xlu0 %910  ;;  %v814_v26 = vmul.f32 %v2949_v44, %v3992_v38  ;;  %v815_v57 = vmul.f32 %v2949_v44, %v727_v25 }
 0x137   : > { %v1069_v19 = vmax.f32 %v1037_v46, 0.0  ;;  %v1008_v61 = vmul.f32 %v2955_v16, %v911_v32  ;;  %2148 = vmatmul.mubr.bf16.gmra.mrb[4].mxu0 %v1096_v52 }
 0x138   : > { %v846_v27 = vadd.f32 %v814_v26, %v650_v58  ;;  %v847_v56 = vadd.f32 %v815_v57, %v651_v53 }
 0x139   : > { %v1040_v13 = vadd.f32 %v1008_v61, %v844_v48  ;;  %v731_v23 = vpop.permute.xlu1 %730  ;;  %v1097_v3 = vpack.c.bf16 %v1070_v31, %v1069_v19  ;;  %v3997_v61 = vld [vmem:[#allocation14_spill] sm:$0xff] }
 0x13a   : > { %774 = vperm.xlu1 %2295, %v2998_v11   ;;  %v915_v62 = vpop.permute.xlu0 %914  ;;  %v816_v47 = vmul.f32 %v2949_v44, %v731_v23  ;;  %v621_v54 = vmul.f32 %v2927_v50, %v3997_v61 }
 0x13b   : > { %v1072_v37 = vmax.f32 %v1040_v13, 0.0  ;;  %v1009_v14 = vmul.f32 %v2955_v16, %v915_v62  ;;  %2151 = vmatprep.mubr.bf16.mxu0 %v1097_v3  ;;  %v422_v13 = vmul.f32 %v2920_v20, %v3998_v7  ;;  %v624_v62 = vmul.f32 %v2927_v50, %v3999_v36 }
 0x13c   : > { %v848_v15 = vadd.f32 %v816_v47, %v652_v9 }
 0x13d   : > { %v1098_v5 = vpack.c.bf16 %v1072_v37, %v1071_v34  ;;  %v1041_v33 = vadd.f32 %v1009_v14, %v845_v45  ;;  %v458_v10 = vadd.f32 %v2941_v40, %v422_v13  ;;  %v818_v45 = vmul.f32 %v2949_v44, %v4000_v63 }
 0x13e   : > { %778 = vperm.xlu1 %2295, %v2705_v28   ;;  %v919_v60 = vpop.permute.xlu1 %918  ;;  %v927_v0 = vpop.permute.xlu0 %926 }
 0x13f   : > { %v1010_v35 = vmul.f32 %v2955_v16, %v919_v60  ;;  %v1012_v29 = vmul.f32 %v2955_v16, %v927_v0  ;;  %2152 = vmatmul.mubr.bf16.gmra.mrb[8].mxu0 %v1098_v5  ;;  %v1073_v55 = vmax.f32 %v1041_v33, 0.0 }
 0x141   : > { %v1042_v17 = vadd.f32 %v1010_v35, %v846_v27  ;;  %v1044_v28 = vadd.f32 %v1012_v29, %v848_v15 }
 0x142   : > { %2296 = vset.pattern.permute.xlu1 %v3993_v1  ;;  %v923_v24 = vpop.permute.xlu1 %922  ;;  %v931_v26 = vpop.permute.xlu0 %930 }
 0x143   : > { %v1074_v43 = vmax.f32 %v1042_v17, 0.0  ;;  %v1011_v59 = vmul.f32 %v2955_v16, %v923_v24  ;;  %966 = vperm.xlu1 %2296, %v2633_v12   ;;  %v1076_v46 = vmax.f32 %v1044_v28, 0.0  ;;  %v3995_v12 = vld [vmem:[#allocation7_spill] sm:$0xff]  ;;  %v1013_v14 = vmul.f32 %v2955_v16, %v931_v26  ;;  %v4002_v26 = vld [vmem:[#allocation16_spill] sm:$0xff] }
 0x144   : > { %v2312_v17 = vld [vmem:[%s3930_s1 + $0x40] sm:$0xff]  }
 0x145   : > { %v1043_v21 = vadd.f32 %v1011_v59, %v847_v56  ;;  %v1099_v6 = vpack.c.bf16 %v1074_v43, %v1073_v55  ;;  %2175 = vmatprep.subr.bf16.mxu1 %v2312_v17 }
 0x146   : > { %v943_v8 = vpop.permute.xlu0 %942  ;;  %2176 = vmatpush3.bf16.msra.mxu1 %v2312_v17 }
 0x147   : > { %v1075_v25 = vmax.f32 %v1043_v21, 0.0  ;;  %970 = vperm.xlu1 %2296, %v2998_v11   ;;  %v324_v52 = vpop.permute.xlu1 %323  ;;  %2155 = vmatprep.mubr.bf16.mxu0 %v1099_v6  ;;  %v1016_v33 = vmul.f32 %v2955_v16, %v943_v8  ;;  %v4004_v8 = vld [vmem:[#allocation24_spill] sm:$0xff] }
 0x148   : > { %v421_v19 = vmul.f32 %v2920_v20, %v324_v52 }
 0x149   : > { %v1100_v48 = vpack.c.bf16 %v1076_v46, %v1075_v25  ;;  %v2313_v46 = vld [vmem:[%s3930_s1 + $0x48] sm:$0xff]  }
 0x14a   : > { %v457_v39 = vadd.f32 %v2941_v40, %v421_v19  ;;  %2177 = vmatprep.subr.bf16.mxu1 %v2313_v46 }
 0x14b   : > { %2297 = vset.pattern.permute.xlu1 %v3987_v42  ;;  %v334_v31 = vpop.permute.xlu1 %333  ;;  %2156 = vmatmul.mubr.bf16.gmra.mrb[12].mxu0 %v1100_v48 }
 0x14c   : > { %383 = vperm.xlu1 %2297, %v3994_v18   ;;  %v653_v34 = vadd.f32 %v621_v54, %v457_v39  ;;  %v423_v37 = vmul.f32 %v2920_v20, %v334_v31  ;;  %2178 = vmatpush3.bf16.msra.mxu1 %v2313_v46  ;;  %v2319_v54 = vld [vmem:[%s3930_s1 + $0x78] sm:$0xff]  }
 0x14e   : > { %v459_v60 = vadd.f32 %v2941_v40, %v423_v37 }
 0x14f   : > { %v339_v32 = vpop.permute.xlu1 %338 }
 0x150   : > { %393 = vperm.xlu1 %2297, %v3115_v4   ;;  %v424_v23 = vmul.f32 %v2920_v20, %v339_v32 }
 0x152   : > { %v460_v58 = vadd.f32 %v2941_v40, %v424_v23  ;;  %v4001_v23 = vld [vmem:[#allocation9_spill] sm:$0xff] }
 0x154   : > { %398 = vperm.xlu1 %2297, %v3995_v12   ;;  %v543_v22 = vpop.permute.xlu1 %542  ;;  %v656_v9 = vadd.f32 %v624_v62, %v460_v58  ;;  %v947_v62 = vpop.permute.xlu0 %946 }
 0x155   : > { %v622_v38 = vmul.f32 %v2927_v50, %v543_v22  ;;  %v2315_v22 = vld [vmem:[%s3930_s1 + $0x58] sm:$0xff]  }
 0x157   : > { %v654_v47 = vadd.f32 %v622_v38, %v458_v10 }
 0x158   : > { %2299 = vset.pattern.permute.xlu1 %v3988_v41  ;;  %v547_v11 = vpop.permute.xlu1 %546 }
 0x159   : > { %590 = vperm.xlu1 %2299, %v3996_v49   ;;  %v623_v57 = vmul.f32 %v2927_v50, %v547_v11  ;;  %v850_v53 = vadd.f32 %v818_v45, %v654_v47  ;;  %v1017_v45 = vmul.f32 %v2955_v16, %v947_v62  ;;  %v4003_v47 = vld [vmem:[#allocation17_spill] sm:$0xff] }
 0x15b   : > { %v655_v56 = vadd.f32 %v623_v57, %v459_v60  ;;  %v822_v57 = vmul.f32 %v2949_v44, %v4004_v8 }
 0x15d   : > { %594 = vperm.xlu1 %2299, %v3115_v4   ;;  %v735_v42 = vpop.permute.xlu1 %734 }
 0x15e   : > { %v817_v3 = vmul.f32 %v2949_v44, %v735_v42  ;;  %v2318_v42 = vld [vmem:[%s3930_s1 + $0x70] sm:$0xff]  }
 0x161   : > { %2301 = vset.pattern.permute.xlu1 %v3990_v30  ;;  %v743_v41 = vpop.permute.xlu1 %742  ;;  %v849_v30 = vadd.f32 %v817_v3, %v653_v34  ;;  %v625_v34 = vmul.f32 %v2927_v50, %v4002_v26 }
 0x162   : > { %782 = vperm.xlu1 %2301, %v3994_v18   ;;  %v819_v35 = vmul.f32 %v2949_v44, %v743_v41  ;;  %v2314_v18 = vld [vmem:[%s3930_s1 + $0x50] sm:$0xff]   ;;  %v426_v41 = vmul.f32 %v2920_v20, %v4001_v23  ;;  %v4006_v23 = vld [vmem:[#allocation18_spill] sm:$0xff] }
 0x163   : > { %v1045_v0 = vadd.f32 %v1013_v14, %v849_v30  ;;  %2179 = vmatprep.subr.bf16.mxu1 %v2314_v18 }
 0x164   : > { %v851_v28 = vadd.f32 %v819_v35, %v655_v56  ;;  %2180 = vmatpush3.bf16.msra.mxu1 %v2314_v18 }
 0x165   : > { %v747_v2 = vpop.permute.xlu1 %746  ;;  %v1077_v55 = vmax.f32 %v1045_v0, 0.0  ;;  %2181 = vmatprep.subr.bf16.mxu1 %v2315_v22  ;;  %v959_v0 = vpop.permute.xlu0 %958 }
 0x166   : > { %790 = vperm.xlu1 %2301, %v3115_v4   ;;  %v820_v5 = vmul.f32 %v2949_v44, %v747_v2  ;;  %v462_v2 = vadd.f32 %v2941_v40, %v426_v41  ;;  %v629_v41 = vmul.f32 %v2927_v50, %v4006_v23 }
 0x168   : > { %v852_v29 = vadd.f32 %v820_v5, %v656_v9  ;;  %2182 = vmatpush3.bf16.msra.mxu1 %v2315_v22  ;;  %v628_v5 = vmul.f32 %v2927_v50, %v4003_v47  ;;  %v4008_v47 = vld [vmem:[#allocation25_spill] sm:$0xff] }
 0x16a   : > { %794 = vperm.xlu1 %2301, %v3995_v12   ;;  %v935_v27 = vpop.permute.xlu1 %934  ;;  %v1048_v59 = vadd.f32 %v1016_v33, %v852_v29 }
 0x16b   : > { %v1014_v15 = vmul.f32 %v2955_v16, %v935_v27 }
 0x16c   : > { %v1080_v48 = vmax.f32 %v1048_v59, 0.0 }
 0x16d   : > { %v1046_v24 = vadd.f32 %v1014_v15, %v850_v53  ;;  %v1020_v53 = vmul.f32 %v2955_v16, %v959_v0 }
 0x16e   : > { %2303 = vset.pattern.permute.xlu1 %v3993_v1  ;;  %v939_v43 = vpop.permute.xlu1 %938 }
 0x16f   : > { %v1078_v21 = vmax.f32 %v1046_v24, 0.0  ;;  %v1015_v6 = vmul.f32 %v2955_v16, %v939_v43  ;;  %982 = vperm.xlu1 %2303, %v3996_v49   ;;  %v2317_v49 = vld [vmem:[%s3930_s1 + $0x68] sm:$0xff]  }
 0x171   : > { %v1047_v25 = vadd.f32 %v1015_v6, %v851_v28  ;;  %v1101_v52 = vpack.c.bf16 %v1078_v21, %v1077_v55 }
 0x173   : > { %v1079_v31 = vmax.f32 %v1047_v25, 0.0  ;;  %986 = vperm.xlu1 %2303, %v3115_v4   ;;  %v344_v1 = vpop.permute.xlu1 %343  ;;  %2159 = vmatprep.mubr.bf16.mxu0 %v1101_v52  ;;  %v2316_v4 = vld [vmem:[%s3930_s1 + $0x60] sm:$0xff]  }
 0x174   : > { %2183 = vmatprep.subr.bf16.mxu1 %v2316_v4  ;;  %v425_v39 = vmul.f32 %v2920_v20, %v344_v1 }
 0x175   : > { %v1102_v32 = vpack.c.bf16 %v1080_v48, %v1079_v31  ;;  %2184 = vmatpush3.bf16.msra.mxu1 %v2316_v4 }
 0x176   : > { %2185 = vmatprep.subr.bf16.mxu1 %v2317_v49  ;;  %v461_v13 = vadd.f32 %v2941_v40, %v425_v39 }
 0x177   : > { %v354_v12 = vpop.permute.xlu1 %353  ;;  %2160 = vmatmul.mubr.bf16.gmra.mrb[16].mxu0 %v1102_v32 }
 0x178   : > { %v657_v58 = vadd.f32 %v625_v34, %v461_v13  ;;  %v427_v14 = vmul.f32 %v2920_v20, %v354_v12 }
 0x179   : > { %2186 = vmatpush3.bf16.msra.mxu1 %v2317_v49 }
 0x17a   : > { %2187 = vmatprep.subr.bf16.mxu1 %v2318_v42  ;;  %v463_v35 = vadd.f32 %v2941_v40, %v427_v14 }
 0x17b   : > { %v359_v11 = vpop.permute.xlu1 %358 }
 0x17c   : > { %v428_v3 = vmul.f32 %v2920_v20, %v359_v11 }
 0x17d   : > { %2188 = vmatpush3.bf16.msra.mxu1 %v2318_v42 }
 0x17e   : > { %2189 = vmatprep.subr.bf16.mxu1 %v2319_v54  ;;  %v464_v37 = vadd.f32 %v2941_v40, %v428_v3 }
 0x180   : > { %v559_v19 = vpop.permute.xlu1 %558  ;;  %v660_v27 = vadd.f32 %v628_v5, %v464_v37  ;;  %v4007_v37 = vld [vmem:[#allocation19_spill] sm:$0xff]  ;;  %v826_v5 = vmul.f32 %v2949_v44, %v4008_v47 }
 0x181   : > { %2190 = vmatpush3.bf16.msra.mxu1 %v2319_v54  ;;  %v626_v36 = vmul.f32 %v2927_v50, %v559_v19  ;;  %v4005_v54 = vld [vmem:[#allocation10_spill] sm:$0xff] }
 0x182   : > { %v430_v39 = vmul.f32 %v2920_v20, %v4005_v54  ;;  %v4010_v54 = vld [vmem:[#allocation20_spill] sm:$0xff] }
 0x183   : > { %v658_v9 = vadd.f32 %v626_v36, %v462_v2 }
 0x184   : > { %v563_v61 = vpop.permute.xlu1 %562  ;;  %v466_v34 = vadd.f32 %v2941_v40, %v430_v39  ;;  %v633_v39 = vmul.f32 %v2927_v50, %v4010_v54 }
 0x185   : > { %v627_v33 = vmul.f32 %v2927_v50, %v563_v61  ;;  %v854_v24 = vadd.f32 %v822_v57, %v658_v9 }
 0x187   : > { %v659_v43 = vadd.f32 %v627_v33, %v463_v35 }
 0x189   : > { %v751_v7 = vpop.permute.xlu1 %750 }
 0x18a   : > { %v821_v10 = vmul.f32 %v2949_v44, %v751_v7 }
 0x18c   : > { %v853_v63 = vadd.f32 %v821_v10, %v657_v58  ;;  %v963_v58 = vpop.permute.xlu0 %962 }
 0x18d   : > { %v759_v38 = vpop.permute.xlu1 %758 }
 0x18e   : > { %v1049_v29 = vadd.f32 %v1017_v45, %v853_v63  ;;  %v823_v17 = vmul.f32 %v2949_v44, %v759_v38  ;;  %v1021_v45 = vmul.f32 %v2955_v16, %v963_v58 }
 0x190   : > { %v1081_v59 = vmax.f32 %v1049_v29, 0.0  ;;  %v855_v6 = vadd.f32 %v823_v17, %v659_v43 }
 0x191   : > { %v763_v30 = vpop.permute.xlu1 %762 }
 0x192   : > { %v824_v60 = vmul.f32 %v2949_v44, %v763_v30  ;;  %v632_v30 = vmul.f32 %v2927_v50, %v4007_v37 }
 0x194   : > { %v856_v56 = vadd.f32 %v824_v60, %v660_v27 }
 0x196   : > { %v951_v15 = vpop.permute.xlu1 %950  ;;  %v1052_v46 = vadd.f32 %v1020_v53, %v856_v56  ;;  %v975_v53 = vpop.permute.xlu0 %974 }
 0x197   : > { %v1018_v55 = vmul.f32 %v2955_v16, %v951_v15  ;;  %v1024_v15 = vmul.f32 %v2955_v16, %v975_v53 }
 0x198   : > { %v1084_v1 = vmax.f32 %v1052_v46, 0.0 }
 0x199   : > { %v1050_v28 = vadd.f32 %v1018_v55, %v854_v24 }
 0x19a   : > { %v955_v21 = vpop.permute.xlu1 %954  ;;  %v979_v23 = vpop.permute.xlu0 %978 }
 0x19b   : > { %v1082_v25 = vmax.f32 %v1050_v28, 0.0  ;;  %v1019_v52 = vmul.f32 %v2955_v16, %v955_v21  ;;  %v1025_v37 = vmul.f32 %v2955_v16, %v979_v23 }
 0x19d   : > { %v1051_v48 = vadd.f32 %v1019_v52, %v855_v6  ;;  %v1103_v31 = vpack.c.bf16 %v1082_v25, %v1081_v59 }
 0x19f   : > { %v1083_v18 = vmax.f32 %v1051_v48, 0.0  ;;  %v364_v32 = vpop.permute.xlu1 %363  ;;  %2163 = vmatprep.mubr.bf16.mxu0 %v1103_v31 }
 0x1a0   : > { %v429_v19 = vmul.f32 %v2920_v20, %v364_v32 }
 0x1a1   : > { %v1104_v12 = vpack.c.bf16 %v1084_v1, %v1083_v18 }
 0x1a2   : > { %v465_v61 = vadd.f32 %v2941_v40, %v429_v19 }
 0x1a3   : > { %v374_v22 = vpop.permute.xlu1 %373  ;;  %2164 = vmatmul.mubr.bf16.gmra.mrb[20].mxu0 %v1104_v12 }
 0x1a4   : > { %v661_v26 = vadd.f32 %v629_v41, %v465_v61  ;;  %v431_v62 = vmul.f32 %v2920_v20, %v374_v22 }
 0x1a6   : > { %v467_v9 = vadd.f32 %v2941_v40, %v431_v62 }
 0x1a7   : > { %v379_v11 = vpop.permute.xlu1 %378 }
 0x1a8   : > { %v432_v7 = vmul.f32 %v2920_v20, %v379_v11 }
 0x1aa   : > { %v468_v10 = vadd.f32 %v2941_v40, %v432_v7 }
 0x1ac   : > { %v575_v4 = vpop.permute.xlu1 %574  ;;  %v664_v57 = vadd.f32 %v632_v30, %v468_v10  ;;  %v830_v30 = vmul.f32 %v2949_v44, %v2972_v51 }
 0x1ad   : > { %v630_v38 = vmul.f32 %v2927_v50, %v575_v4 }
 0x1af   : > { %v662_v14 = vadd.f32 %v630_v38, %v466_v34 }
 0x1b0   : > { %v579_v49 = vpop.permute.xlu1 %578 }
 0x1b1   : > { %v631_v8 = vmul.f32 %v2927_v50, %v579_v49  ;;  %v858_v35 = vadd.f32 %v826_v5, %v662_v14  ;;  %v4009_v49 = vld [vmem:[#allocation11_spill] sm:$0xff] }
 0x1b2   : > { %v434_v19 = vmul.f32 %v2920_v20, %v4009_v49 }
 0x1b3   : > { %v663_v17 = vadd.f32 %v631_v8, %v467_v9 }
 0x1b5   : > { %v767_v42 = vpop.permute.xlu1 %766 }
 0x1b6   : > { %v825_v3 = vmul.f32 %v2949_v44, %v767_v42 }
 0x1b8   : > { %v857_v2 = vadd.f32 %v825_v3, %v661_v26  ;;  %v470_v3 = vadd.f32 %v2941_v40, %v434_v19 }
 0x1b9   : > { %v775_v13 = vpop.permute.xlu1 %774 }
 0x1ba   : > { %v1053_v60 = vadd.f32 %v1021_v45, %v857_v2  ;;  %v827_v33 = vmul.f32 %v2949_v44, %v775_v13  ;;  %v991_v45 = vpop.permute.xlu0 %990 }
 0x1bc   : > { %v1085_v24 = vmax.f32 %v1053_v60, 0.0  ;;  %v859_v43 = vadd.f32 %v827_v33, %v663_v17 }
 0x1bd   : > { %v779_v36 = vpop.permute.xlu1 %778 }
 0x1be   : > { %v828_v63 = vmul.f32 %v2949_v44, %v779_v36  ;;  %v4011_v36 = vld [vmem:[#allocation21_spill] sm:$0xff] }
 0x1bf   : > { %v636_v62 = vmul.f32 %v2927_v50, %v4011_v36 }
 0x1c0   : > { %v860_v27 = vadd.f32 %v828_v63, %v664_v57 }
 0x1c2   : > { %v967_v0 = vpop.permute.xlu1 %966  ;;  %v1056_v28 = vadd.f32 %v1024_v15, %v860_v27 }
 0x1c3   : > { %v1022_v29 = vmul.f32 %v2955_v16, %v967_v0  ;;  %v1028_v0 = vmul.f32 %v2955_v16, %v991_v45 }
 0x1c4   : > { %v1088_v25 = vmax.f32 %v1056_v28, 0.0 }
 0x1c5   : > { %v1054_v56 = vadd.f32 %v1022_v29, %v858_v35 }
 0x1c6   : > { %v971_v55 = vpop.permute.xlu1 %970 }
 0x1c7   : > { %v1086_v59 = vmax.f32 %v1054_v56, 0.0  ;;  %v1023_v21 = vmul.f32 %v2955_v16, %v971_v55  ;;  %v3252_v55 = vld [vmem:[%s3931_s2 + $0x9] ss:$0 sm:$0xff] }
 0x1c9   : > { %v1055_v6 = vadd.f32 %v1023_v21, %v859_v43  ;;  %v1105_v46 = vpack.c.bf16 %v1086_v59, %v1085_v24 }
 0x1cb   : > { %v1087_v52 = vmax.f32 %v1055_v6, 0.0  ;;  %v384_v48 = vpop.permute.xlu1 %383  ;;  %2167 = vmatprep.mubr.bf16.mxu0 %v1105_v46 }
 0x1cc   : > { %v433_v22 = vmul.f32 %v2920_v20, %v384_v48 }
 0x1cd   : > { %v1106_v31 = vpack.c.bf16 %v1088_v25, %v1087_v52 }
 0x1ce   : > { %v469_v4 = vadd.f32 %v2941_v40, %v433_v22 }
 0x1cf   : > { %v394_v1 = vpop.permute.xlu1 %393  ;;  %2168 = vmatmul.mubr.bf16.gmra.mrb[24].mxu0 %v1106_v31 }
 0x1d0   : > { %v665_v41 = vadd.f32 %v633_v39, %v469_v4  ;;  %v435_v34 = vmul.f32 %v2920_v20, %v394_v1 }
 0x1d2   : > { %v471_v47 = vadd.f32 %v2941_v40, %v435_v34 }
 0x1d3   : > { %v399_v18 = vpop.permute.xlu1 %398 }
 0x1d4   : > { %v436_v42 = vmul.f32 %v2920_v20, %v399_v18 }
 0x1d6   : > { %v472_v38 = vadd.f32 %v2941_v40, %v436_v42 }
 0x1d8   : > { %v591_v32 = vpop.permute.xlu1 %590  ;;  %v668_v63 = vadd.f32 %v636_v62, %v472_v38 }
 0x1d9   : > { %v634_v13 = vmul.f32 %v2927_v50, %v591_v32 }
 0x1db   : > { %v666_v58 = vadd.f32 %v634_v13, %v470_v3 }
 0x1dc   : > { %v595_v12 = vpop.permute.xlu1 %594 }
 0x1dd   : > { %v635_v14 = vmul.f32 %v2927_v50, %v595_v12  ;;  %v862_v9 = vadd.f32 %v830_v30, %v666_v58 }
 0x1df   : > { %v667_v33 = vadd.f32 %v635_v14, %v471_v47 }
 0x1e1   : > { %v783_v11 = vpop.permute.xlu1 %782 }
 0x1e2   : > { %v829_v7 = vmul.f32 %v2949_v44, %v783_v11 }
 0x1e4   : > { %v861_v10 = vadd.f32 %v829_v7, %v665_v41 }
 0x1e5   : > { %v791_v61 = vpop.permute.xlu1 %790 }
 0x1e6   : > { %v1057_v5 = vadd.f32 %v1025_v37, %v861_v10  ;;  %v831_v8 = vmul.f32 %v2949_v44, %v791_v61 }
 0x1e8   : > { %v1089_v35 = vmax.f32 %v1057_v5, 0.0  ;;  %v863_v29 = vadd.f32 %v831_v8, %v667_v33 }
 0x1e9   : > { %v795_v26 = vpop.permute.xlu1 %794 }
 0x1ea   : > { %v832_v2 = vmul.f32 %v2949_v44, %v795_v26 }
 0x1ec   : > { %v864_v57 = vadd.f32 %v832_v2, %v668_v63 }
 0x1ee   : > { %v983_v20 = vpop.permute.xlu1 %982  ;;  %v1060_v50 = vadd.f32 %v1028_v0, %v864_v57 }
 0x1ef   : > { %v1026_v60 = vmul.f32 %v2955_v16, %v983_v20 }
 0x1f0   : > { %v1092_v56 = vmax.f32 %v1060_v50, 0.0 }
 0x1f1   : > { %v1058_v27 = vadd.f32 %v1026_v60, %v862_v9 }
 0x1f2   : > { %v987_v51 = vpop.permute.xlu1 %986 }
 0x1f3   : > { %v1090_v53 = vmax.f32 %v1058_v27, 0.0  ;;  %v1027_v15 = vmul.f32 %v2955_v16, %v987_v51 }
 0x1f5   : > { %v1059_v40 = vadd.f32 %v1027_v15, %v863_v29  ;;  %v1107_v17 = vpack.c.bf16 %v1090_v53, %v1089_v35 }
 0x1f7   : > { %v1091_v24 = vmax.f32 %v1059_v40, 0.0  ;;  %2171 = vmatprep.mubr.bf16.mxu0 %v1107_v17 }
 0x1f9   : > { %v1108_v44 = vpack.c.bf16 %v1092_v56, %v1091_v24 }
 0x1fb   : > { %2172 = vmatmul.mubr.bf16.gmra.mrb[28].mxu0 %v1108_v44 }
 0x202   : > { %v2145_v43 = vpop.f32.mrb[0].mxu0 }
 0x203   : > { %v1204_v28 = vadd.f32 %v2145_v43, %v3252_v55  ;;  %v1195_v59 = vpop.f32.mrb[1].mxu0 }
 0x204   : > { %v1196_v21 = vadd.f32 %v3252_v55, %v1195_v59  ;;  %v2146_v6 = vpop.f32.mrb[2].mxu0 }
 0x205   : > { %v1207_v16 = vadd.f32 %v2146_v6, %v3252_v55  ;;  %v1198_v46 = vpop.f32.mrb[3].mxu0  ;;  %v1324_v52 = vmax.f32 %v1204_v28, 0.0 }
 0x206   : > { %v1199_v25 = vadd.f32 %v3252_v55, %v1198_v46  ;;  %v1322_v31 = vmax.f32 %v1196_v21, 0.0 }
 0x207   : > { %v1325_v48 = vmax.f32 %v1207_v16, 0.0 }
 0x208   : > { %v1323_v1 = vmax.f32 %v1199_v25, 0.0 }
 0x209   : > { %v1355_v18 = vpack.c.bf16 %v1325_v48, %v1324_v52 }
 0x20a   : > { %v2149_v32 = vpop.f32.mrb[4].mxu0  ;;  %v1354_v12 = vpack.c.bf16 %v1323_v1, %v1322_v31 }
 0x20b   : > { %v1220_v22 = vadd.f32 %v2149_v32, %v3252_v55  ;;  %v1211_v11 = vpop.f32.mrb[5].mxu0 }
 0x20c   : > { %v1212_v4 = vadd.f32 %v3252_v55, %v1211_v11  ;;  %v2150_v49 = vpop.f32.mrb[6].mxu0  ;;  %2191 = vmatprep.mubr.bf16.mxu1 %v1354_v12 }
 0x20d   : > { %v1223_v19 = vadd.f32 %v2150_v49, %v3252_v55  ;;  %v1214_v42 = vpop.f32.mrb[7].mxu0  ;;  %2192 = vmatmul.mubr.bf16.vlgmr.msra.gmra.mrb[0].mxu1 %v1355_v18  ;;  %v1328_v54 = vmax.f32 %v1220_v22, 0.0 }
 0x20e   : > { %v1215_v61 = vadd.f32 %v3252_v55, %v1214_v42  ;;  %v1326_v7 = vmax.f32 %v1212_v4, 0.0 }
 0x20f   : > { %v1329_v39 = vmax.f32 %v1223_v19, 0.0 }
 0x210   : > { %v1327_v13 = vmax.f32 %v1215_v61, 0.0 }
 0x211   : > { %v1357_v23 = vpack.c.bf16 %v1329_v39, %v1328_v54 }
 0x212   : > { %v1356_v41 = vpack.c.bf16 %v1327_v13, %v1326_v7  ;;  %v2153_v3 = vpop.f32.mrb[8].mxu0 }
 0x213   : > { %v1236_v38 = vadd.f32 %v2153_v3, %v3252_v55  ;;  %v1227_v26 = vpop.f32.mrb[9].mxu0 }
 0x214   : > { %v1228_v34 = vadd.f32 %v3252_v55, %v1227_v26  ;;  %v2154_v10 = vpop.f32.mrb[10].mxu0  ;;  %2195 = vmatprep.mubr.bf16.mxu1 %v1356_v41 }
 0x215   : > { %v1239_v36 = vadd.f32 %v2154_v10, %v3252_v55  ;;  %v1230_v62 = vpop.f32.mrb[11].mxu0  ;;  %2196 = vmatmul.mubr.bf16.gmra.mrb[4].mxu1 %v1357_v23  ;;  %v1332_v2 = vmax.f32 %v1236_v38, 0.0 }
 0x216   : > { %v1231_v58 = vadd.f32 %v3252_v55, %v1230_v62  ;;  %v1330_v30 = vmax.f32 %v1228_v34, 0.0 }
 0x217   : > { %v1333_v37 = vmax.f32 %v1239_v36, 0.0 }
 0x218   : > { %v1331_v14 = vmax.f32 %v1231_v58, 0.0 }
 0x219   : > { %v1359_v63 = vpack.c.bf16 %v1333_v37, %v1332_v2 }
 0x21a   : > { %v1358_v45 = vpack.c.bf16 %v1331_v14, %v1330_v30 }
 0x21c   : > { %2199 = vmatprep.mubr.bf16.mxu1 %v1358_v45 }
 0x21d   : > { %2200 = vmatmul.mubr.bf16.gmra.mrb[8].mxu1 %v1359_v63 }
 0x21e   : > { %v2157_v47 = vpop.f32.mrb[12].mxu0 }
 0x21f   : > { %v1252_v5 = vadd.f32 %v2157_v47, %v3252_v55  ;;  %v1243_v20 = vpop.f32.mrb[13].mxu0 }
 0x220   : > { %v1244_v8 = vadd.f32 %v3252_v55, %v1243_v20  ;;  %v2158_v57 = vpop.f32.mrb[14].mxu0 }
 0x221   : > { %v1255_v9 = vadd.f32 %v2158_v57, %v3252_v55  ;;  %v1246_v60 = vpop.f32.mrb[15].mxu0  ;;  %v1336_v33 = vmax.f32 %v1252_v5, 0.0 }
 0x222   : > { %v1247_v0 = vadd.f32 %v3252_v55, %v1246_v60  ;;  %v1334_v35 = vmax.f32 %v1244_v8, 0.0 }
 0x223   : > { %v1337_v27 = vmax.f32 %v1255_v9, 0.0 }
 0x224   : > { %v1335_v51 = vmax.f32 %v1247_v0, 0.0  ;;  %v4012_v0 = vlaneseq }
 0x225   : > { %v1361_v29 = vpack.c.bf16 %v1337_v27, %v1336_v33  ;;  %v3292_v27 = vld [vmem:[%s3931_s2 + $0xa] ss:$0 sm:$0xff] }
 0x226   : > { %v1360_v50 = vpack.c.bf16 %v1335_v51, %v1334_v35  ;;  %v3287_v33 = vand.u32 127, %v4012_v0 }
 0x228   : > { %2203 = vmatprep.mubr.bf16.mxu1 %v1360_v50  ;;  %vm1585_vm0 = vcmp.lt.s32.totalorder %v3287_v33, 2  ;;  %vm1906_vm1 = vcmp.eq.s32.totalorder %v3287_v33, 2 }
 0x229   : > { %2204 = vmatmul.mubr.bf16.gmra.mrb[12].mxu1 %v1361_v29 }
 0x24a   : > { %v2161_v53 = vpop.f32.mrb[16].mxu0 }
 0x24b   : > { %v1268_v15 = vadd.f32 %v2161_v53, %v3252_v55  ;;  %v1259_v40 = vpop.f32.mrb[17].mxu0 }
 0x24c   : > { %v1260_v17 = vadd.f32 %v3252_v55, %v1259_v40  ;;  %v2162_v56 = vpop.f32.mrb[18].mxu0 }
 0x24d   : > { %v1271_v24 = vadd.f32 %v2162_v56, %v3252_v55  ;;  %v1262_v44 = vpop.f32.mrb[19].mxu0  ;;  %v1340_v28 = vmax.f32 %v1268_v15, 0.0 }
 0x24e   : > { %v1263_v43 = vadd.f32 %v3252_v55, %v1262_v44  ;;  %v1338_v21 = vmax.f32 %v1260_v17, 0.0 }
 0x24f   : > { %v1341_v59 = vmax.f32 %v1271_v24, 0.0 }
 0x250   : > { %v1339_v6 = vmax.f32 %v1263_v43, 0.0 }
 0x251   : > { %v1363_v16 = vpack.c.bf16 %v1341_v59, %v1340_v28 }
 0x252   : > { %v1362_v46 = vpack.c.bf16 %v1339_v6, %v1338_v21 }
 0x254   : > { %2207 = vmatprep.mubr.bf16.mxu1 %v1362_v46 }
 0x255   : > { %2208 = vmatmul.mubr.bf16.gmra.mrb[16].mxu1 %v1363_v16 }
 0x276   : > { %v2165_v25 = vpop.f32.mrb[20].mxu0 }
 0x277   : > { %v1284_v52 = vadd.f32 %v2165_v25, %v3252_v55  ;;  %v1275_v48 = vpop.f32.mrb[21].mxu0 }
 0x278   : > { %v1276_v31 = vadd.f32 %v3252_v55, %v1275_v48  ;;  %v2166_v1 = vpop.f32.mrb[22].mxu0 }
 0x279   : > { %v1287_v18 = vadd.f32 %v2166_v1, %v3252_v55  ;;  %v1278_v32 = vpop.f32.mrb[23].mxu0  ;;  %v1344_v22 = vmax.f32 %v1284_v52, 0.0 }
 0x27a   : > { %v1279_v12 = vadd.f32 %v3252_v55, %v1278_v32  ;;  %v1342_v4 = vmax.f32 %v1276_v31, 0.0 }
 0x27b   : > { %v1345_v11 = vmax.f32 %v1287_v18, 0.0 }
 0x27c   : > { %v1343_v49 = vmax.f32 %v1279_v12, 0.0 }
 0x27d   : > { %v1365_v19 = vpack.c.bf16 %v1345_v11, %v1344_v22 }
 0x27e   : > { %v1364_v42 = vpack.c.bf16 %v1343_v49, %v1342_v4 }
 0x280   : > { %2211 = vmatprep.mubr.bf16.mxu1 %v1364_v42 }
 0x281   : > { %2212 = vmatmul.mubr.bf16.gmra.mrb[20].mxu1 %v1365_v19 }
 0x2a2   : > { %v2169_v61 = vpop.f32.mrb[24].mxu0 }
 0x2a3   : > { %v1300_v54 = vadd.f32 %v2169_v61, %v3252_v55  ;;  %v1291_v39 = vpop.f32.mrb[25].mxu0 }
 0x2a4   : > { %v1292_v7 = vadd.f32 %v3252_v55, %v1291_v39  ;;  %v2170_v13 = vpop.f32.mrb[26].mxu0 }
 0x2a5   : > { %v1303_v23 = vadd.f32 %v2170_v13, %v3252_v55  ;;  %v1294_v41 = vpop.f32.mrb[27].mxu0  ;;  %v1348_v38 = vmax.f32 %v1300_v54, 0.0 }
 0x2a6   : > { %v1295_v3 = vadd.f32 %v3252_v55, %v1294_v41  ;;  %v1346_v34 = vmax.f32 %v1292_v7, 0.0 }
 0x2a7   : > { %v1349_v26 = vmax.f32 %v1303_v23, 0.0 }
 0x2a8   : > { %v1347_v10 = vmax.f32 %v1295_v3, 0.0 }
 0x2a9   : > { %v1367_v36 = vpack.c.bf16 %v1349_v26, %v1348_v38 }
 0x2aa   : > { %v1366_v62 = vpack.c.bf16 %v1347_v10, %v1346_v34 }
 0x2ac   : > { %2215 = vmatprep.mubr.bf16.mxu1 %v1366_v62 }
 0x2ad   : > { %2216 = vmatmul.mubr.bf16.gmra.mrb[24].mxu1 %v1367_v36 }
 0x2ce   : > { %v2173_v58 = vpop.f32.mrb[28].mxu0 }
 0x2cf   : > { %v1316_v2 = vadd.f32 %v2173_v58, %v3252_v55  ;;  %v1307_v37 = vpop.f32.mrb[29].mxu0 }
 0x2d0   : > { %v1308_v30 = vadd.f32 %v3252_v55, %v1307_v37  ;;  %v2174_v14 = vpop.f32.mrb[30].mxu0 }
 0x2d1   : > { %v1319_v63 = vadd.f32 %v2174_v14, %v3252_v55  ;;  %v1310_v45 = vpop.f32.mrb[31].mxu0  ;;  %v1352_v5 = vmax.f32 %v1316_v2, 0.0 }
 0x2d2   : > { %v1311_v47 = vadd.f32 %v3252_v55, %v1310_v45  ;;  %v1350_v8 = vmax.f32 %v1308_v30, 0.0 }
 0x2d3   : > { %v1353_v20 = vmax.f32 %v1319_v63, 0.0 }
 0x2d4   : > { %v1351_v57 = vmax.f32 %v1311_v47, 0.0 }
 0x2d5   : > { %v1369_v9 = vpack.c.bf16 %v1353_v20, %v1352_v5 }
 0x2d6   : > { %v1368_v60 = vpack.c.bf16 %v1351_v57, %v1350_v8 }
 0x2d8   : > { %2219 = vmatprep.mubr.bf16.mxu1 %v1368_v60 }
 0x2d9   : > { %2220 = vmatmul.mubr.bf16.gmra.mrb[28].mxu1 %v1369_v9 }
 0x2e0   : > { %v2193_v35 = vpop.f32.mrb[0].mxu1 }
 0x2e1   : > { %v3296_v55 = vadd.f32 %v2193_v35, %v3292_v27  ;;  %v1456_v51 = vpop.f32.mrb[1].mxu1 }
 0x2e2   : > { %v3299_v29 = vadd.f32 %v3292_v27, %v1456_v51  ;;  %v2194_v50 = vpop.f32.mrb[2].mxu1 }
 0x2e3   : > { %v1459_v53 = vpop.f32.mrb[3].mxu1  ;;  %v3304_v15 = vsel %vm1585_vm0, %v3296_v55, -inf  ;;  %v3307_v40 = vadd.f32 %v2194_v50, %v3292_v27 }
 0x2e4   : > { %v3310_v17 = vadd.f32 %v3292_v27, %v1459_v53  ;;  %1622 = vmax.xlane.f32.xlu0 %v3304_v15  ;;  %v3316_v56 = vsel %vm1585_vm0, %v3299_v29, -inf }
 0x2e5   : > { %1618 = vmax.xlane.f32.xlu1 %v3316_v56  ;;  %v3328_v43 = vsel %vm1585_vm0, %v3307_v40, -inf }
 0x2e6   : > { %v3322_v24 = vsel %vm1585_vm0, %v3310_v17, -inf }
 0x2e8   : > { %1620 = vmax.xlane.f32.xlu0 %v3322_v24  ;;  %v2197_v44 = vpop.f32.mrb[4].mxu1 }
 0x2e9   : > { %v3331_v28 = vadd.f32 %v2197_v44, %v3292_v27  ;;  %1624 = vmax.xlane.f32.xlu1 %v3328_v43  ;;  %v1472_v59 = vpop.f32.mrb[5].mxu1 }
 0x2ea   : > { %v2198_v21 = vpop.f32.mrb[6].mxu1  ;;  %v3335_v6 = vadd.f32 %v3292_v27, %v1472_v59 }
 0x2eb   : > { %v3338_v16 = vadd.f32 %v2198_v21, %v3292_v27  ;;  %v1475_v46 = vpop.f32.mrb[7].mxu1  ;;  %v3343_v25 = vsel %vm1585_vm0, %v3331_v28, -inf }
 0x2ec   : > { %1630 = vmax.xlane.f32.xlu0 %v3343_v25  ;;  %v3347_v52 = vadd.f32 %v3292_v27, %v1475_v46  ;;  %v3358_v31 = vsel %vm1585_vm0, %v3335_v6, -inf }
 0x2ed   : > { %v3352_v48 = vsel %vm1585_vm0, %v3338_v16, -inf }
 0x2ee   : > { %1632 = vmax.xlane.f32.xlu1 %v3352_v48  ;;  %v3367_v12 = vsel %vm1585_vm0, %v3347_v52, -inf }
 0x2f0   : > { %1626 = vmax.xlane.f32.xlu0 %v3358_v31  ;;  %v2201_v1 = vpop.f32.mrb[8].mxu1 }
 0x2f1   : > { %v3362_v18 = vadd.f32 %v2201_v1, %v3292_v27  ;;  %v1488_v32 = vpop.f32.mrb[9].mxu1 }
 0x2f2   : > { %1628 = vmax.xlane.f32.xlu1 %v3367_v12  ;;  %v2202_v22 = vpop.f32.mrb[10].mxu1  ;;  %v3371_v11 = vadd.f32 %v3292_v27, %v1488_v32 }
 0x2f3   : > { %v3374_v4 = vadd.f32 %v2202_v22, %v3292_v27  ;;  %v1491_v49 = vpop.f32.mrb[11].mxu1  ;;  %v3379_v19 = vsel %vm1585_vm0, %v3362_v18, -inf }
 0x2f4   : > { %1638 = vmax.xlane.f32.xlu0 %v3379_v19  ;;  %v3383_v42 = vadd.f32 %v3292_v27, %v1491_v49  ;;  %v3394_v54 = vsel %vm1585_vm0, %v3371_v11, -inf }
 0x2f5   : > { %v3388_v61 = vsel %vm1585_vm0, %v3374_v4, -inf }
 0x2f6   : > { %1640 = vmax.xlane.f32.xlu1 %v3388_v61  ;;  %v3400_v39 = vsel %vm1585_vm0, %v3383_v42, -inf }
 0x2f8   : > { %1634 = vmax.xlane.f32.xlu0 %v3394_v54 }
 0x2fa   : > { %1636 = vmax.xlane.f32.xlu1 %v3400_v39 }
 0x2fc   : > { %v2205_v7 = vpop.f32.mrb[12].mxu1 }
 0x2fd   : > { %v3404_v13 = vadd.f32 %v2205_v7, %v3292_v27  ;;  %v1504_v23 = vpop.f32.mrb[13].mxu1 }
 0x2fe   : > { %v2206_v41 = vpop.f32.mrb[14].mxu1  ;;  %v3407_v3 = vadd.f32 %v3292_v27, %v1504_v23 }
 0x2ff   : > { %v3410_v38 = vadd.f32 %v2206_v41, %v3292_v27  ;;  %v1507_v26 = vpop.f32.mrb[15].mxu1  ;;  %v3415_v34 = vsel %vm1585_vm0, %v3404_v13, -inf }
 0x300   : > { %4013 = vst [vmem:[#allocation12_spill] sm:$0xff] %v3407_v3  ;;  %1646 = vmax.xlane.f32.xlu0 %v3415_v34  ;;  %v3419_v10 = vadd.f32 %v3292_v27, %v1507_v26  ;;  %v3430_v62 = vsel %vm1585_vm0, %v3407_v3, -inf }
 0x301   : > { %v3424_v36 = vsel %vm1585_vm0, %v3410_v38, -inf }
 0x302   : > { %4014 = vst [vmem:[#allocation13_spill] sm:$0xff] %v3419_v10  ;;  %1648 = vmax.xlane.f32.xlu1 %v3424_v36  ;;  %v3436_v58 = vsel %vm1585_vm0, %v3419_v10, -inf }
 0x304   : > { %1642 = vmax.xlane.f32.xlu0 %v3430_v62 }
 0x306   : > { %1644 = vmax.xlane.f32.xlu1 %v3436_v58 }
 0x328   : > { %v2209_v2 = vpop.f32.mrb[16].mxu1 }
 0x329   : > { %v3440_v37 = vadd.f32 %v2209_v2, %v3292_v27  ;;  %v1520_v30 = vpop.f32.mrb[17].mxu1 }
 0x32a   : > { %v2210_v14 = vpop.f32.mrb[18].mxu1  ;;  %v3443_v63 = vadd.f32 %v3292_v27, %v1520_v30 }
 0x32b   : > { %4015 = vst [vmem:[#allocation22_spill] sm:$0xff] %v3440_v37  ;;  %v3446_v45 = vadd.f32 %v2210_v14, %v3292_v27  ;;  %v1523_v47 = vpop.f32.mrb[19].mxu1  ;;  %v3451_v5 = vsel %vm1585_vm0, %v3440_v37, -inf }
 0x32c   : > { %4016 = vst [vmem:[#allocation6_spill] sm:$0xff] %v3443_v63  ;;  %1654 = vmax.xlane.f32.xlu0 %v3451_v5  ;;  %v3455_v20 = vadd.f32 %v3292_v27, %v1523_v47  ;;  %v3466_v57 = vsel %vm1585_vm0, %v3443_v63, -inf }
 0x32d   : > { %4017 = vst [vmem:[#allocation7_spill] sm:$0xff] %v3446_v45  ;;  %v3460_v8 = vsel %vm1585_vm0, %v3446_v45, -inf }
 0x32e   : > { %4018 = vst [vmem:[#allocation5_spill] sm:$0xff] %v3455_v20  ;;  %1656 = vmax.xlane.f32.xlu1 %v3460_v8  ;;  %v3472_v9 = vsel %vm1585_vm0, %v3455_v20, -inf }
 0x330   : > { %1650 = vmax.xlane.f32.xlu0 %v3466_v57 }
 0x332   : > { %1652 = vmax.xlane.f32.xlu1 %v3472_v9 }
 0x354   : > { %v2213_v60 = vpop.f32.mrb[20].mxu1 }
 0x355   : > { %v3476_v0 = vadd.f32 %v2213_v60, %v3292_v27  ;;  %v1536_v35 = vpop.f32.mrb[21].mxu1 }
 0x356   : > { %v2214_v51 = vpop.f32.mrb[22].mxu1  ;;  %v3479_v50 = vadd.f32 %v3292_v27, %v1536_v35 }
 0x357   : > { %4019 = vst [vmem:[#allocation14_spill] sm:$0xff] %v3476_v0  ;;  %v3482_v53 = vadd.f32 %v2214_v51, %v3292_v27  ;;  %v1539_v44 = vpop.f32.mrb[23].mxu1  ;;  %v3487_v59 = vsel %vm1585_vm0, %v3476_v0, -inf }
 0x358   : > { %4020 = vst [vmem:[#allocation8_spill] sm:$0xff] %v3479_v50  ;;  %1662 = vmax.xlane.f32.xlu0 %v3487_v59  ;;  %v3491_v21 = vadd.f32 %v3292_v27, %v1539_v44  ;;  %v3502_v1 = vsel %vm1585_vm0, %v3479_v50, -inf }
 0x359   : > { %4021 = vst [vmem:[#allocation15_spill] sm:$0xff] %v3482_v53  ;;  %v3496_v46 = vsel %vm1585_vm0, %v3482_v53, -inf }
 0x35a   : > { %4022 = vst [vmem:[#allocation23_spill] sm:$0xff] %v3491_v21  ;;  %1664 = vmax.xlane.f32.xlu1 %v3496_v46  ;;  %v3508_v32 = vsel %vm1585_vm0, %v3491_v21, -inf }
 0x35c   : > { %1658 = vmax.xlane.f32.xlu0 %v3502_v1 }
 0x35e   : > { %1660 = vmax.xlane.f32.xlu1 %v3508_v32 }
 0x371   : > { %v1623_v51 = vpop.xlane.xlu0 %1622 }
 0x372   : > { %v1619_v44 = vpop.xlane.xlu1 %1618 }
 0x373   : > { %v1682_v21 = vsub.f32 %v3316_v56, %v1619_v44 }
 0x375   : > { %v1714_v63 = vmul.f32 1.442695, %v1682_v21 }
 0x380   : > { %v2217_v22 = vpop.f32.mrb[24].mxu1 }
 0x381   : > { %v3512_v49 = vadd.f32 %v2217_v22, %v3292_v27  ;;  %v1552_v7 = vpop.f32.mrb[25].mxu1  ;;  %v1621_v22 = vpop.xlane.xlu0 %1620 }
 0x382   : > { %v2218_v23 = vpop.f32.mrb[26].mxu1  ;;  %v3515_v41 = vadd.f32 %v3292_v27, %v1552_v7  ;;  %v1625_v7 = vpop.xlane.xlu1 %1624 }
 0x383   : > { %4023 = vst [vmem:[#allocation9_spill] sm:$0xff] %v3512_v49  ;;  %v3518_v26 = vadd.f32 %v2218_v23, %v3292_v27  ;;  %v1555_v2 = vpop.f32.mrb[27].mxu1  ;;  %v3523_v30 = vsel %vm1585_vm0, %v3512_v49, -inf }
 0x384   : > { %4024 = vst [vmem:[#allocation16_spill] sm:$0xff] %v3515_v41  ;;  %1670 = vmax.xlane.f32.xlu0 %v3523_v30  ;;  %v3527_v14 = vadd.f32 %v3292_v27, %v1555_v2  ;;  %v3538_v60 = vsel %vm1585_vm0, %v3515_v41, -inf  ;;  %v1685_v41 = vsub.f32 %v3328_v43, %v1625_v7 }
 0x385   : > { %4025 = vst [vmem:[#allocation17_spill] sm:$0xff] %v3518_v26  ;;  %v3532_v47 = vsel %vm1585_vm0, %v3518_v26, -inf  ;;  %v1631_v23 = vpop.xlane.xlu0 %1630  ;;  %v1684_v26 = vsub.f32 %v3304_v15, %v1623_v51 }
 0x386   : > { %4026 = vst [vmem:[#allocation24_spill] sm:$0xff] %v3527_v14  ;;  %1672 = vmax.xlane.f32.xlu1 %v3532_v47  ;;  %v3544_v35 = vsel %vm1585_vm0, %v3527_v14, -inf  ;;  %v1633_v2 = vpop.xlane.xlu1 %1632  ;;  %v1683_v14 = vsub.f32 %v3322_v24, %v1621_v22  ;;  %v1720_v0 = vmul.f32 1.442695, %v1685_v41  ;;  %v1688_v10 = vsub.f32 %v3343_v25, %v1631_v23 }
 0x387   : > { %v1718_v53 = vmul.f32 1.442695, %v1684_v26  ;;  %v1689_v26 = vsub.f32 %v3352_v48, %v1633_v2 }
 0x388   : > { %1666 = vmax.xlane.f32.xlu0 %v3538_v60  ;;  %v1716_v43 = vmul.f32 1.442695, %v1683_v14 }
 0x389   : > { %v1627_v49 = vpop.xlane.xlu0 %1626  ;;  %2320 = vpow2.f32 %v1718_v53  ;;  %v1728_v41 = vmul.f32 1.442695, %v1689_v26 }
 0x38a   : > { %1668 = vmax.xlane.f32.xlu1 %v3544_v35  ;;  %v1629_v50 = vpop.xlane.xlu1 %1628  ;;  %2322 = vpow2.f32 %v1720_v0  ;;  %v1686_v0 = vsub.f32 %v3358_v31, %v1627_v49 }
 0x38b   : > { %2324 = vpow2.f32 %v1714_v63  ;;  %v1687_v63 = vsub.f32 %v3367_v12, %v1629_v50 }
 0x38c   : > { %2326 = vpow2.f32 %v1716_v43 }
 0x38d   : > { %v1639_v45 = vpop.xlane.xlu0 %1638  ;;  %v1724_v50 = vmul.f32 1.442695, %v1687_v63 }
 0x38e   : > { %v1641_v51 = vpop.xlane.xlu1 %1640  ;;  %v1692_v49 = vsub.f32 %v3379_v19, %v1639_v45 }
 0x38f   : > { %v1693_v22 = vsub.f32 %v3388_v61, %v1641_v51 }
 0x390   : > { %v1734_v19 = vmul.f32 1.442695, %v1692_v49 }
 0x392   : > { %v1637_v31 = vpop.xlane.xlu1 %1636 }
 0x393   : > { %v3592_v12 = vpop.eup %2320  ;;  %v1691_v43 = vsub.f32 %v3400_v39, %v1637_v31 }
 0x394   : > { %v3595_v7 = vpop.eup %2322 }
 0x395   : > { %v3599_v2 = vpop.eup %2324 }
 0x396   : > { %v1649_v23 = vpop.xlane.xlu1 %1648  ;;  %v3604_v61 = vpop.eup %2326 }
 0x3ac   : > { %v2221_v20 = vpop.f32.mrb[28].mxu1 }
 0x3ad   : > { %v1568_v37 = vpop.f32.mrb[29].mxu1  ;;  %v3557_v24 = vadd.f32 %v2221_v20, %v3292_v27  ;;  %v1635_v20 = vpop.xlane.xlu0 %1634 }
 0x3ae   : > { %v3553_v3 = vadd.f32 %v3292_v27, %v1568_v37  ;;  %v2222_v15 = vpop.f32.mrb[30].mxu1  ;;  %v1726_v37 = vmul.f32 1.442695, %v1688_v10  ;;  %v1690_v45 = vsub.f32 %v3394_v54, %v1635_v20  ;;  %v1697_v20 = vsub.f32 %v3424_v36, %v1649_v23 }
 0x3af   : > { %v1571_v56 = vpop.f32.mrb[31].mxu1  ;;  %v3570_v53 = vadd.f32 %v2222_v15, %v3292_v27  ;;  %v3582_v10 = vsel %vm1585_vm0, %v3557_v24, -inf  ;;  %v1736_v15 = vmul.f32 1.442695, %v1693_v22 }
 0x3b0   : > { %v3560_v21 = vadd.f32 %v3292_v27, %v1571_v56  ;;  %v3565_v25 = vsel %vm1585_vm0, %v3553_v3, -inf  ;;  %2328 = vpow2.f32 %v1726_v37  ;;  %v1722_v27 = vmul.f32 1.442695, %v1686_v0  ;;  %v1645_v37 = vpop.xlane.xlu1 %1644 }
 0x3b1   : > { %1674 = vmax.xlane.f32.xlu0 %v3565_v25  ;;  %v3589_v14 = vsel %vm1585_vm0, %v3570_v53, -inf  ;;  %v1647_v44 = vpop.xlane.xlu0 %1646  ;;  %2330 = vpow2.f32 %v1728_v41  ;;  %v1730_v51 = vmul.f32 1.442695, %v1690_v45  ;;  %v1732_v0 = vmul.f32 1.442695, %v1691_v43 }
 0x3b2   : > { %v3575_v48 = vsel %vm1585_vm0, %v3560_v21, -inf  ;;  %2332 = vpow2.f32 %v1722_v27  ;;  %v1696_v26 = vsub.f32 %v3415_v34, %v1647_v44  ;;  %v1744_v49 = vmul.f32 1.442695, %v1697_v20 }
 0x3b3   : > { %1676 = vmax.xlane.f32.xlu1 %v3575_v48  ;;  %2334 = vpow2.f32 %v1724_v50  ;;  %v1695_v44 = vsub.f32 %v3436_v58, %v1645_v37 }
 0x3b4   : > { %2336 = vpow2.f32 %v1734_v19  ;;  %v1742_v63 = vmul.f32 1.442695, %v1696_v26 }
 0x3b5   : > { %1678 = vmax.xlane.f32.xlu0 %v3582_v10  ;;  %v1643_v56 = vpop.xlane.xlu0 %1642  ;;  %2338 = vpow2.f32 %v1736_v15  ;;  %v1740_v19 = vmul.f32 1.442695, %v1695_v44 }
 0x3b6   : > { %2340 = vpow2.f32 %v1730_v51  ;;  %v1694_v31 = vsub.f32 %v3430_v62, %v1643_v56 }
 0x3b7   : > { %1680 = vmax.xlane.f32.xlu1 %v3589_v14  ;;  %2342 = vpow2.f32 %v1732_v0 }
 0x3b8   : > { %2344 = vpow2.f32 %v1742_v63  ;;  %v1738_v50 = vmul.f32 1.442695, %v1694_v31 }
 0x3b9   : > { %1782 = vadd.xlane.f32.xlu0 %v3592_v12  ;;  %v1655_v41 = vpop.xlane.xlu0 %1654  ;;  %2346 = vpow2.f32 %v1744_v49 }
 0x3ba   : > { %v3608_v54 = vpop.eup %2328  ;;  %v1700_v22 = vsub.f32 %v3451_v5, %v1655_v41  ;;  %2348 = vpow2.f32 %v1738_v50 }
 0x3bb   : > { %1784 = vadd.xlane.f32.xlu1 %v3595_v7  ;;  %v3612_v39 = vpop.eup %2330  ;;  %v1657_v27 = vpop.xlane.xlu1 %1656  ;;  %2350 = vpow2.f32 %v1740_v19 }
 0x3bc   : > { %v3616_v34 = vpop.eup %2332  ;;  %v1701_v45 = vsub.f32 %v3460_v8, %v1657_v27  ;;  %v1750_v43 = vmul.f32 1.442695, %v1700_v22 }
 0x3bd   : > { %1778 = vadd.xlane.f32.xlu0 %v3599_v2  ;;  %v3620_v36 = vpop.eup %2334  ;;  %v1651_v23 = vpop.xlane.xlu0 %1650 }
 0x3be   : > { %v3624_v62 = vpop.eup %2336  ;;  %v1698_v56 = vsub.f32 %v3466_v57, %v1651_v23  ;;  %v1752_v51 = vmul.f32 1.442695, %v1701_v45  ;;  %2352 = vpow2.f32 %v1750_v43 }
 0x3bf   : > { %1780 = vadd.xlane.f32.xlu1 %v3604_v61  ;;  %v1653_v15 = vpop.xlane.xlu1 %1652  ;;  %v3628_v58 = vpop.eup %2338 }
 0x3c0   : > { %v3632_v5 = vpop.eup %2340  ;;  %v1699_v26 = vsub.f32 %v3472_v9, %v1653_v15  ;;  %v1746_v37 = vmul.f32 1.442695, %v1698_v56  ;;  %2354 = vpow2.f32 %v1752_v51 }
 0x3c1   : > { %1790 = vadd.xlane.f32.xlu0 %v3608_v54  ;;  %v3636_v8 = vpop.eup %2342 }
 0x3c2   : > { %v3639_v0 = vpop.eup %2344  ;;  %v1748_v57 = vmul.f32 1.442695, %v1699_v26  ;;  %2356 = vpow2.f32 %v1746_v37 }
 0x3c3   : > { %1792 = vadd.xlane.f32.xlu1 %v3612_v39  ;;  %v3642_v20 = vpop.eup %2346 }
 0x3c4   : > { %v3645_v9 = vpop.eup %2348  ;;  %2358 = vpow2.f32 %v1748_v57 }
 0x3c5   : > { %1786 = vadd.xlane.f32.xlu0 %v3616_v34  ;;  %v3648_v41 = vpop.eup %2350 }
 0x3c7   : > { %1788 = vadd.xlane.f32.xlu1 %v3620_v36 }
 0x3c8   : > { %v3651_v63 = vpop.eup %2352 }
 0x3c9   : > { %1798 = vadd.xlane.f32.xlu0 %v3624_v62 }
 0x3ca   : > { %v3654_v31 = vpop.eup %2354 }
 0x3cb   : > { %1800 = vadd.xlane.f32.xlu1 %v3628_v58 }
 0x3cc   : > { %v3657_v27 = vpop.eup %2356 }
 0x3cd   : > { %1794 = vadd.xlane.f32.xlu0 %v3632_v5 }
 0x3ce   : > { %v3660_v49 = vpop.eup %2358 }
 0x3cf   : > { %1796 = vadd.xlane.f32.xlu1 %v3636_v8 }
 0x3d1   : > { %1806 = vadd.xlane.f32.xlu0 %v3639_v0 }
 0x3d3   : > { %1808 = vadd.xlane.f32.xlu1 %v3642_v20 }
 0x3d5   : > { %1802 = vadd.xlane.f32.xlu0 %v3645_v9 }
 0x3d7   : > { %1804 = vadd.xlane.f32.xlu1 %v3648_v41 }
 0x3d9   : > { %1814 = vadd.xlane.f32.xlu0 %v3651_v63 }
 0x3db   : > { %1816 = vadd.xlane.f32.xlu1 %v3654_v31 }
 0x3dd   : > { %1810 = vadd.xlane.f32.xlu0 %v3657_v27 }
 0x3df   : > { %1812 = vadd.xlane.f32.xlu1 %v3660_v49 }
 0x3e5   : > { %v1663_v44 = vpop.xlane.xlu0 %1662 }
 0x3e6   : > { %v1704_v50 = vsub.f32 %v3487_v59, %v1663_v44 }
 0x3e7   : > { %v1665_v22 = vpop.xlane.xlu1 %1664 }
 0x3e8   : > { %v1758_v23 = vmul.f32 1.442695, %v1704_v50  ;;  %v1705_v19 = vsub.f32 %v3496_v46, %v1665_v22 }
 0x3e9   : > { %v1659_v45 = vpop.xlane.xlu0 %1658 }
 0x3ea   : > { %2360 = vpow2.f32 %v1758_v23  ;;  %v1760_v15 = vmul.f32 1.442695, %v1705_v19  ;;  %v1702_v43 = vsub.f32 %v3502_v1, %v1659_v45 }
 0x3eb   : > { %v1661_v56 = vpop.xlane.xlu1 %1660 }
 0x3ec   : > { %2362 = vpow2.f32 %v1760_v15  ;;  %v1754_v51 = vmul.f32 1.442695, %v1702_v43  ;;  %v1703_v26 = vsub.f32 %v3508_v32, %v1661_v56 }
 0x3ee   : > { %2364 = vpow2.f32 %v1754_v51  ;;  %v1756_v37 = vmul.f32 1.442695, %v1703_v26 }
 0x3f0   : > { %2366 = vpow2.f32 %v1756_v37 }
 0x3f4   : > { %v3667_v57 = vpop.eup %2360 }
 0x3f5   : > { %1822 = vadd.xlane.f32.xlu0 %v3667_v57 }
 0x3f6   : > { %v3670_v59 = vpop.eup %2362 }
 0x3f7   : > { %1824 = vadd.xlane.f32.xlu1 %v3670_v59 }
 0x3f8   : > { %v3673_v46 = vpop.eup %2364 }
 0x3f9   : > { %1818 = vadd.xlane.f32.xlu0 %v3673_v46 }
 0x3fa   : > { %v3676_v1 = vpop.eup %2366 }
 0x3fb   : > { %1820 = vadd.xlane.f32.xlu1 %v3676_v1 }
 0x411   : > { %v1671_v32 = vpop.xlane.xlu0 %1670 }
 0x412   : > { %v1708_v44 = vsub.f32 %v3523_v30, %v1671_v32 }
 0x413   : > { %v1673_v50 = vpop.xlane.xlu1 %1672 }
 0x414   : > { %v1766_v22 = vmul.f32 1.442695, %v1708_v44  ;;  %v1709_v23 = vsub.f32 %v3532_v47, %v1673_v50 }
 0x415   : > { %v1667_v19 = vpop.xlane.xlu0 %1666 }
 0x416   : > { %2368 = vpow2.f32 %v1766_v22  ;;  %v1768_v45 = vmul.f32 1.442695, %v1709_v23  ;;  %v1706_v15 = vsub.f32 %v3538_v60, %v1667_v19 }
 0x417   : > { %v1669_v43 = vpop.xlane.xlu1 %1668 }
 0x418   : > { %2370 = vpow2.f32 %v1768_v45  ;;  %v1762_v56 = vmul.f32 1.442695, %v1706_v15  ;;  %v1707_v51 = vsub.f32 %v3544_v35, %v1669_v43 }
 0x41a   : > { %2372 = vpow2.f32 %v1762_v56  ;;  %v1764_v26 = vmul.f32 1.442695, %v1707_v51 }
 0x41c   : > { %2374 = vpow2.f32 %v1764_v26 }
 0x420   : > { %v3683_v37 = vpop.eup %2368 }
 0x421   : > { %1830 = vadd.xlane.f32.xlu0 %v3683_v37 }
 0x422   : > { %v3686_v30 = vpop.eup %2370 }
 0x423   : > { %1832 = vadd.xlane.f32.xlu1 %v3686_v30 }
 0x424   : > { %v3689_v47 = vpop.eup %2372 }
 0x425   : > { %1826 = vadd.xlane.f32.xlu0 %v3689_v47 }
 0x426   : > { %v3692_v60 = vpop.eup %2374 }
 0x427   : > { %1828 = vadd.xlane.f32.xlu1 %v3692_v60 }
 0x43e   : > { %v1675_v35 = vpop.xlane.xlu0 %1674 }
 0x43f   : > { %v1710_v32 = vsub.f32 %v3565_v25, %v1675_v35 }
 0x440   : > { %v1677_v44 = vpop.xlane.xlu1 %1676 }
 0x441   : > { %v1770_v50 = vmul.f32 1.442695, %v1710_v32  ;;  %v1711_v22 = vsub.f32 %v3575_v48, %v1677_v44 }
 0x442   : > { %v1679_v23 = vpop.xlane.xlu0 %1678 }
 0x443   : > { %2376 = vpow2.f32 %v1770_v50  ;;  %v1772_v19 = vmul.f32 1.442695, %v1711_v22  ;;  %v1712_v45 = vsub.f32 %v3582_v10, %v1679_v23 }
 0x444   : > { %v1681_v15 = vpop.xlane.xlu1 %1680 }
 0x445   : > { %2378 = vpow2.f32 %v1772_v19  ;;  %v1774_v43 = vmul.f32 1.442695, %v1712_v45  ;;  %v1713_v56 = vsub.f32 %v3589_v14, %v1681_v15 }
 0x446   : > { %v1783_v51 = vpop.xlane.xlu0 %1782 }
 0x447   : > { %2380 = vpow2.f32 %v1774_v43  ;;  %v1776_v26 = vmul.f32 1.442695, %v1713_v56 }
 0x448   : > { %2382 = vrcp.f32 %v1783_v51  ;;  %v1785_v25 = vpop.xlane.xlu1 %1784 }
 0x449   : > { %2384 = vpow2.f32 %v1776_v26 }
 0x44a   : > { %2386 = vrcp.f32 %v1785_v25  ;;  %v1779_v48 = vpop.xlane.xlu0 %1778 }
 0x44b   : > { %2388 = vrcp.f32 %v1779_v48 }
 0x44c   : > { %v1781_v35 = vpop.xlane.xlu1 %1780 }
 0x44d   : > { %v3699_v32 = vpop.eup %2376  ;;  %2390 = vrcp.f32 %v1781_v35 }
 0x44e   : > { %1834 = vadd.xlane.f32.xlu0 %v3699_v32  ;;  %v1791_v10 = vpop.xlane.xlu0 %1790 }
 0x44f   : > { %v3703_v44 = vpop.eup %2378  ;;  %2392 = vrcp.f32 %v1791_v10 }
 0x450   : > { %1836 = vadd.xlane.f32.xlu1 %v3703_v44  ;;  %v1793_v14 = vpop.xlane.xlu1 %1792 }
 0x451   : > { %v3708_v50 = vpop.eup %2380  ;;  %2394 = vrcp.f32 %v1793_v14 }
 0x452   : > { %v2383_v22 = vpop.eup %2382  ;;  %1838 = vadd.xlane.f32.xlu0 %v3708_v50  ;;  %v1787_v23 = vpop.xlane.xlu0 %1786 }
 0x453   : > { %v3712_v19 = vpop.eup %2384  ;;  %v1847_v45 = vmul.f32 %v2383_v22, %v3592_v12  ;;  %2396 = vrcp.f32 %v1787_v23 }
 0x454   : > { %v2387_v15 = vpop.eup %2386  ;;  %1840 = vadd.xlane.f32.xlu1 %v3712_v19  ;;  %v1789_v43 = vpop.xlane.xlu1 %1788 }
 0x455   : > { %v2389_v56 = vpop.eup %2388  ;;  %v1909_v51 = vsel %vm1906_vm1, %v3296_v55, %v1847_v45  ;;  %v1849_v26 = vmul.f32 %v2387_v15, %v3595_v7  ;;  %2398 = vrcp.f32 %v1789_v43 }
 0x456   : > { %1941 = vst [vmem:[%s3720_s8 + $0x10] sm:$0xff] %v1909_v51  ;;  %v1843_v12 = vmul.f32 %v2389_v56, %v3599_v2  ;;  %v1799_v25 = vpop.xlane.xlu0 %1798 }
 0x457   : > { %v2391_v48 = vpop.eup %2390  ;;  %v1910_v35 = vsel %vm1906_vm1, %v3307_v40, %v1849_v26  ;;  %2400 = vrcp.f32 %v1799_v25 }
 0x458   : > { %1942 = vst [vmem:[%s3720_s8 + $0x18] sm:$0xff] %v1910_v35  ;;  %v1907_v55 = vsel %vm1906_vm1, %v3299_v29, %v1843_v12  ;;  %v1845_v7 = vmul.f32 %v2391_v48, %v3604_v61  ;;  %v1801_v10 = vpop.xlane.xlu1 %1800 }
 0x459   : > { %v2393_v14 = vpop.eup %2392  ;;  %1939 = vst [vmem:[%s3720_s8] sm:$0xff] %v1907_v55  ;;  %2402 = vrcp.f32 %v1801_v10 }
 0x45a   : > { %v1908_v2 = vsel %vm1906_vm1, %v3310_v17, %v1845_v7  ;;  %v1855_v40 = vmul.f32 %v2393_v14, %v3608_v54  ;;  %v1795_v22 = vpop.xlane.xlu0 %1794 }
 0x45b   : > { %v2395_v23 = vpop.eup %2394  ;;  %1940 = vst [vmem:[%s3720_s8 + $0x8] sm:$0xff] %v1908_v2  ;;  %2404 = vrcp.f32 %v1795_v22 }
 0x45c   : > { %v1913_v29 = vsel %vm1906_vm1, %v3331_v28, %v1855_v40  ;;  %v1857_v61 = vmul.f32 %v2395_v23, %v3612_v39  ;;  %v1797_v45 = vpop.xlane.xlu1 %1796 }
 0x45d   : > { %v2397_v15 = vpop.eup %2396  ;;  %1945 = vst [vmem:[%s3720_s8 + $0x30] sm:$0xff] %v1913_v29  ;;  %2406 = vrcp.f32 %v1797_v45 }
 0x45e   : > { %v1914_v17 = vsel %vm1906_vm1, %v3338_v16, %v1857_v61  ;;  %v1851_v54 = vmul.f32 %v2397_v15, %v3616_v34  ;;  %v1807_v43 = vpop.xlane.xlu0 %1806  ;;  %v4027_v61 = vld [vmem:[#allocation12_spill] sm:$0xff]  ;;  %v4028_v15 = vld [vmem:[#allocation13_spill] sm:$0xff] }
 0x45f   : > { %v2399_v56 = vpop.eup %2398  ;;  %1946 = vst [vmem:[%s3720_s8 + $0x38] sm:$0xff] %v1914_v17  ;;  %2408 = vrcp.f32 %v1807_v43 }
 0x460   : > { %v1911_v28 = vsel %vm1906_vm1, %v3335_v6, %v1851_v54  ;;  %v1853_v39 = vmul.f32 %v2399_v56, %v3620_v36  ;;  %v1809_v51 = vpop.xlane.xlu1 %1808  ;;  %v4029_v54 = vld [vmem:[#allocation22_spill] sm:$0xff] }
 0x461   : > { %v2401_v26 = vpop.eup %2400  ;;  %1943 = vst [vmem:[%s3720_s8 + $0x20] sm:$0xff] %v1911_v28  ;;  %2410 = vrcp.f32 %v1809_v51 }
 0x462   : > { %v1912_v16 = vsel %vm1906_vm1, %v3347_v52, %v1853_v39  ;;  %v1863_v34 = vmul.f32 %v2401_v26, %v3624_v62  ;;  %v1803_v12 = vpop.xlane.xlu0 %1802 }
 0x463   : > { %v2403_v25 = vpop.eup %2402  ;;  %1944 = vst [vmem:[%s3720_s8 + $0x28] sm:$0xff] %v1912_v16  ;;  %2412 = vrcp.f32 %v1803_v12  ;;  %v4031_v16 = vld [vmem:[#allocation6_spill] sm:$0xff]  ;;  %v4032_v12 = vld [vmem:[#allocation5_spill] sm:$0xff] }
 0x464   : > { %v1917_v6 = vsel %vm1906_vm1, %v3362_v18, %v1863_v34  ;;  %v1865_v36 = vmul.f32 %v2403_v25, %v3628_v58  ;;  %v1805_v48 = vpop.xlane.xlu1 %1804 }
 0x465   : > { %v2405_v35 = vpop.eup %2404  ;;  %1949 = vst [vmem:[%s3720_s8 + $0x50] sm:$0xff] %v1917_v6  ;;  %2414 = vrcp.f32 %v1805_v48 }
 0x466   : > { %v1918_v52 = vsel %vm1906_vm1, %v3374_v4, %v1865_v36  ;;  %v1859_v62 = vmul.f32 %v2405_v35, %v3632_v5  ;;  %v1815_v55 = vpop.xlane.xlu0 %1814 }
 0x467   : > { %v2407_v7 = vpop.eup %2406  ;;  %1950 = vst [vmem:[%s3720_s8 + $0x58] sm:$0xff] %v1918_v52  ;;  %2416 = vrcp.f32 %v1815_v55  ;;  %v4033_v52 = vld [vmem:[#allocation14_spill] sm:$0xff] }
 0x468   : > { %v1915_v18 = vsel %vm1906_vm1, %v3371_v11, %v1859_v62  ;;  %v1861_v58 = vmul.f32 %v2407_v7, %v3636_v8  ;;  %v1817_v10 = vpop.xlane.xlu1 %1816 }
 0x469   : > { %v2409_v14 = vpop.eup %2408  ;;  %1947 = vst [vmem:[%s3720_s8 + $0x40] sm:$0xff] %v1915_v18  ;;  %2418 = vrcp.f32 %v1817_v10  ;;  %v4034_v18 = vld [vmem:[#allocation15_spill] sm:$0xff] }
 0x46a   : > { %v1916_v4 = vsel %vm1906_vm1, %v3383_v42, %v1861_v58  ;;  %v1871_v5 = vmul.f32 %v2409_v14, %v3639_v0  ;;  %v1811_v2 = vpop.xlane.xlu0 %1810 }
 0x46b   : > { %v2411_v40 = vpop.eup %2410  ;;  %1948 = vst [vmem:[%s3720_s8 + $0x48] sm:$0xff] %v1916_v4  ;;  %2420 = vrcp.f32 %v1811_v2  ;;  %v4035_v4 = vld [vmem:[#allocation8_spill] sm:$0xff]  ;;  %v4036_v2 = vld [vmem:[#allocation23_spill] sm:$0xff] }
 0x46c   : > { %v1921_v11 = vsel %vm1906_vm1, %v3404_v13, %v1871_v5  ;;  %v1873_v8 = vmul.f32 %v2411_v40, %v3642_v20  ;;  %v1813_v22 = vpop.xlane.xlu1 %1812 }
 0x46d   : > { %v2413_v23 = vpop.eup %2412  ;;  %1953 = vst [vmem:[%s3720_s8 + $0x70] sm:$0xff] %v1921_v11  ;;  %2422 = vrcp.f32 %v1813_v22 }
 0x46e   : > { %v1922_v42 = vsel %vm1906_vm1, %v3410_v38, %v1873_v8  ;;  %v1867_v0 = vmul.f32 %v2413_v23, %v3645_v9 }
 0x46f   : > { %v2415_v29 = vpop.eup %2414  ;;  %1954 = vst [vmem:[%s3720_s8 + $0x78] sm:$0xff] %v1922_v42  ;;  %v4037_v42 = vld [vmem:[#allocation9_spill] sm:$0xff] }
 0x470   : > { %v1919_v13 = vsel %vm1906_vm1, %v4027_v61, %v1867_v0  ;;  %v1869_v20 = vmul.f32 %v2415_v29, %v3648_v41  ;;  %v4030_v41 = vld [vmem:[#allocation7_spill] sm:$0xff] }
 0x471   : > { %v2417_v45 = vpop.eup %2416  ;;  %1951 = vst [vmem:[%s3720_s8 + $0x60] sm:$0xff] %v1919_v13  ;;  %v4038_v13 = vld [vmem:[#allocation17_spill] sm:$0xff] }
 0x472   : > { %v1920_v17 = vsel %vm1906_vm1, %v4028_v15, %v1869_v20  ;;  %v1879_v38 = vmul.f32 %v2417_v45, %v3651_v63 }
 0x473   : > { %v2419_v9 = vpop.eup %2418  ;;  %1952 = vst [vmem:[%s3720_s8 + $0x68] sm:$0xff] %v1920_v17  ;;  %v4039_v17 = vld [vmem:[#allocation16_spill] sm:$0xff] }
 0x474   : > { %v1925_v43 = vsel %vm1906_vm1, %v4029_v54, %v1879_v38  ;;  %v1881_v56 = vmul.f32 %v2419_v9, %v3654_v31  ;;  %v4040_v9 = vld [vmem:[#allocation24_spill] sm:$0xff] }
 0x475   : > { %v2421_v28 = vpop.eup %2420  ;;  %1957 = vst [vmem:[%s3720_s8 + $0x90] sm:$0xff] %v1925_v43 }
 0x476   : > { %v1926_v39 = vsel %vm1906_vm1, %v4030_v41, %v1881_v56  ;;  %v1875_v51 = vmul.f32 %v2421_v28, %v3657_v27 }
 0x477   : > { %v2423_v26 = vpop.eup %2422  ;;  %1958 = vst [vmem:[%s3720_s8 + $0x98] sm:$0xff] %v1926_v39 }
 0x478   : > { %v1923_v63 = vsel %vm1906_vm1, %v4031_v16, %v1875_v51  ;;  %v1877_v34 = vmul.f32 %v2423_v26, %v3660_v49 }
 0x479   : > { %1955 = vst [vmem:[%s3720_s8 + $0x80] sm:$0xff] %v1923_v63 }
 0x47a   : > { %v1924_v31 = vsel %vm1906_vm1, %v4032_v12, %v1877_v34 }
 0x47b   : > { %1956 = vst [vmem:[%s3720_s8 + $0x88] sm:$0xff] %v1924_v31 }
 0x482   : > { %v1823_v25 = vpop.xlane.xlu0 %1822 }
 0x483   : > { %2424 = vrcp.f32 %v1823_v25 }
 0x484   : > { %v1825_v6 = vpop.xlane.xlu1 %1824 }
 0x485   : > { %2426 = vrcp.f32 %v1825_v6 }
 0x486   : > { %v1819_v27 = vpop.xlane.xlu0 %1818 }
 0x487   : > { %2428 = vrcp.f32 %v1819_v27 }
 0x488   : > { %v1821_v36 = vpop.xlane.xlu1 %1820 }
 0x489   : > { %2430 = vrcp.f32 %v1821_v36 }
 0x48d   : > { %v2425_v48 = vpop.eup %2424 }
 0x48e   : > { %v1887_v49 = vmul.f32 %v2425_v48, %v3667_v57 }
 0x48f   : > { %v2427_v35 = vpop.eup %2426 }
 0x490   : > { %v1929_v62 = vsel %vm1906_vm1, %v4033_v52, %v1887_v49  ;;  %v1889_v55 = vmul.f32 %v2427_v35, %v3670_v59 }
 0x491   : > { %v2429_v7 = vpop.eup %2428  ;;  %1961 = vst [vmem:[%s3720_s8 + $0xb0] sm:$0xff] %v1929_v62 }
 0x492   : > { %v1930_v58 = vsel %vm1906_vm1, %v4034_v18, %v1889_v55  ;;  %v1883_v10 = vmul.f32 %v2429_v7, %v3673_v46 }
 0x493   : > { %v2431_v14 = vpop.eup %2430  ;;  %1962 = vst [vmem:[%s3720_s8 + $0xb8] sm:$0xff] %v1930_v58 }
 0x494   : > { %v1927_v57 = vsel %vm1906_vm1, %v4035_v4, %v1883_v10  ;;  %v1885_v5 = vmul.f32 %v2431_v14, %v3676_v1 }
 0x495   : > { %1959 = vst [vmem:[%s3720_s8 + $0xa0] sm:$0xff] %v1927_v57 }
 0x496   : > { %v1928_v59 = vsel %vm1906_vm1, %v4036_v2, %v1885_v5 }
 0x497   : > { %1960 = vst [vmem:[%s3720_s8 + $0xa8] sm:$0xff] %v1928_v59 }
 0x4ae   : > { %v1831_v40 = vpop.xlane.xlu0 %1830 }
 0x4af   : > { %2432 = vrcp.f32 %v1831_v40 }
 0x4b0   : > { %v1833_v11 = vpop.xlane.xlu1 %1832 }
 0x4b1   : > { %2434 = vrcp.f32 %v1833_v11 }
 0x4b2   : > { %v1827_v46 = vpop.xlane.xlu0 %1826 }
 0x4b3   : > { %2436 = vrcp.f32 %v1827_v46 }
 0x4b4   : > { %v1829_v8 = vpop.xlane.xlu1 %1828 }
 0x4b5   : > { %2438 = vrcp.f32 %v1829_v8 }
 0x4b9   : > { %v2433_v22 = vpop.eup %2432 }
 0x4ba   : > { %v1895_v1 = vmul.f32 %v2433_v22, %v3683_v37 }
 0x4bb   : > { %v2435_v23 = vpop.eup %2434 }
 0x4bc   : > { %v1933_v0 = vsel %vm1906_vm1, %v4037_v42, %v1895_v1  ;;  %v1897_v29 = vmul.f32 %v2435_v23, %v3686_v30 }
 0x4bd   : > { %v2437_v61 = vpop.eup %2436  ;;  %1965 = vst [vmem:[%s3720_s8 + $0xd0] sm:$0xff] %v1933_v0 }
 0x4be   : > { %v1934_v20 = vsel %vm1906_vm1, %v4038_v13, %v1897_v29  ;;  %v1891_v45 = vmul.f32 %v2437_v61, %v3689_v47 }
 0x4bf   : > { %v2439_v15 = vpop.eup %2438  ;;  %1966 = vst [vmem:[%s3720_s8 + $0xd8] sm:$0xff] %v1934_v20 }
 0x4c0   : > { %v1931_v37 = vsel %vm1906_vm1, %v4039_v17, %v1891_v45  ;;  %v1893_v38 = vmul.f32 %v2439_v15, %v3692_v60 }
 0x4c1   : > { %1963 = vst [vmem:[%s3720_s8 + $0xc0] sm:$0xff] %v1931_v37 }
 0x4c2   : > { %v1932_v30 = vsel %vm1906_vm1, %v4040_v9, %v1893_v38 }
 0x4c3   : > { %1964 = vst [vmem:[%s3720_s8 + $0xc8] sm:$0xff] %v1932_v30 }
 0x4db   : > { %v1835_v54 = vpop.xlane.xlu0 %1834 }
 0x4dc   : > { %2440 = vrcp.f32 %v1835_v54 }
 0x4dd   : > { %v1837_v47 = vpop.xlane.xlu1 %1836 }
 0x4de   : > { %2442 = vrcp.f32 %v1837_v47 }
 0x4df   : > { %v1839_v43 = vpop.xlane.xlu0 %1838 }
 0x4e0   : > { %2444 = vrcp.f32 %v1839_v43 }
 0x4e1   : > { %v1841_v56 = vpop.xlane.xlu1 %1840 }
 0x4e2   : > { %2446 = vrcp.f32 %v1841_v56 }
 0x4e6   : > { %v2441_v28 = vpop.eup %2440 }
 0x4e7   : > { %v1899_v60 = vmul.f32 %v2441_v28, %v3699_v32 }
 0x4e8   : > { %v2443_v41 = vpop.eup %2442 }
 0x4e9   : > { %v1935_v39 = vsel %vm1906_vm1, %v3553_v3, %v1899_v60  ;;  %v1901_v51 = vmul.f32 %v2443_v41, %v3703_v44 }
 0x4ea   : > { %v2445_v26 = vpop.eup %2444  ;;  %1967 = vst [vmem:[%s3720_s8 + $0xe0] sm:$0xff] %v1935_v39 }
 0x4eb   : > { %v1936_v16 = vsel %vm1906_vm1, %v3560_v21, %v1901_v51  ;;  %v1903_v32 = vmul.f32 %v2445_v26, %v3708_v50 }
 0x4ec   : > { %v2447_v63 = vpop.eup %2446  ;;  %1968 = vst [vmem:[%s3720_s8 + $0xe8] sm:$0xff] %v1936_v16 }
 0x4ed   : > { %v1937_v3 = vsel %vm1906_vm1, %v3557_v24, %v1903_v32  ;;  %v1905_v44 = vmul.f32 %v2447_v63, %v3712_v19 }
 0x4ee   : > { %1969 = vst [vmem:[%s3720_s8 + $0xf0] sm:$0xff] %v1937_v3 }
 0x4ef   : > { %v1938_v21 = vsel %vm1906_vm1, %v3570_v53, %v1905_v44 }
 0x4f0   : > { %1970 = vst [vmem:[%s3720_s8 + $0xf8] sm:$0xff] %v1938_v21 }
 0x4f1   : > { %2461 = shalt.err (!%p2458_p3)
}
 0x4f2   : > { %s2462_s27 = scalar_lea.hbm %s3877_s16, 4096  ;;  %s2466_s4 = scalar_lea.hbm %s3932_s3, 8192 }
 0x4f3   : > { %p2463_p4 = scmp.ne.s32.totalorder %s3877_s16, %s2462_s27  ;;  %p2467_p9 = scmp.lt.u32.totalorder %s3877_s16, %s3932_s3 }
 0x4f4   : > { %p2468_p10 = scmp.lt.u32.totalorder %s2466_s4, %s2462_s27  ;;  %p2470_p12 = scmp.lt.u32.totalorder %s2462_s27, %s3877_s16 }
 0x4f5   : > { %p2464_p7 = pnand %p2463_p4, %p2577_p5 }
 0x4f6   : > { %p2469_p11 = por %p2468_p10, %p2467_p9 }
 0x4f7   : > { %p2465_p8 = pneg %p2464_p7 }
 0x4f8   : > { %p2471_p13 = por %p2470_p12, %p2469_p11 }
 0x4fa   : > { %p2472_p0 = pnand %p2471_p13, %p2465_p8 }
 0x4fc   : > { %2475 = shalt.err (!%p2472_p0)
}
 0x4fd   : > { %s2517_s6 = smov 128   ;;  %s2518_s7 = smov 8  }
 0x4fe   : > { %2223 = dma.vmem_to_hbm [thread:$0]  (%p2577_p5), %s3879_s10, 4096, %s3877_s16, %s3888_s19, %s2517_s6, %s2517_s6, %s2518_s7  }
 0x4ff PF: > { %p2229_p1 = scmp.ge.s32.totalorder %s2510_s15, 2  ;;  %s2000_s8 = sand.u32 1, %s2498_s12  }
 0x500   : > { %s2001_s9 = scalar_lea.sflag [#allocation3], %s2000_s8 }
 0x501   : > { %p2226_p2 = pnand %p2229_p1, %p2581_p6 }
 0x503   : > { %2493 = dma.done.wait (!%p2226_p2), %s2001_s9, 4096  }
 0x504   : > { %2495 = vsyncadd (!%p2226_p2), %s2001_s9, 4294963200  ;;  %p13_p3 = scmp.ge.s32.totalorder %s2564_s18, 4   ;;  %s4041_s12 = smov %s2502_s13 }
 0x505   : > { %s4042_s13 = smov %s2506_s14  ;;  %s4043_s14 = smov %s2575_s21 }
 0x506   : > { %s4044_s15 = smov %s2564_s18  ;;  %15 = sbr.rel (!%p13_p3) target bundleno = 3 (0x3), region = 67 }
 0x50d   :  { %2006 = vsyncpa [#allocation3], 1 }
 0x50e   :  { %2008 = vsyncpa [#allocation3 + $0x1], 1 }

</bundles_post_ra>
